<compile_context>
chip_gen: v6e
topology: v6e:2x2x1
jax: 0.10.0
libtpu: 0.0.40
codegen_flags: <defaults>
</compile_context>

<pallas_src>
import jax
import jax.numpy as jnp
from jax.experimental import pallas as pl
from jax.experimental.pallas import tpu as pltpu  # noqa: F401  (CompilerParams only needed at larger tilings)

# ----------------------------- problem sizes -----------------------------
N = 16          # number of nodes (single node type)
C = 32          # hidden_channels (= in = out for both HANConv layers)
HEADS = 4       # heads=4 as in the module
D = C // HEADS  # per-head dim
E = 2           # number of edge types (metapaths)
K = E * HEADS * N   # 128 : lane extent of the (e, h, src) packing


# ------------------------------ kernel body -------------------------------
def _han_layer(x, shared, wp, bp, a_both, wk_bd, bk_w, q_w):
    """One HANConv layer on values already resident in VMEM / vregs."""
    (maskb, lanesel, xrep, hmsel, segsum, segexp, dup, blocksum, ones_nn) = shared
    n = x.shape[0]

    # 1. node-type projection (MXU)
    xp = jnp.dot(x, wp, preferred_element_type=jnp.float32) + bp              # [N, C]

    # 2. node-level attention, batched over ALL (e, h) pairs (lane layout k*N + j)
    ab = jnp.dot(xp, a_both, preferred_element_type=jnp.float32)              # [N, 2K]
    al_dst = ab[:, :K]                                                        # [N, K]: <xp[i], a_dst[e,h]>
    g = ab[:, K:]                                                             # [N, K]: <xp[i], a_src[e,h]>
    # re-index src scores by each lane's own src node j:  al_src[i, k*N+j] = g[j, k*N+j]
    al_src = jnp.dot(ones_nn, g * lanesel, preferred_element_type=jnp.float32)  # [N, K]
    logits = al_dst + al_src
    logits = jnp.maximum(logits, 0.2 * logits)                                # leaky_relu(0.2)

    # masked softmax over src within each 16-lane (e, h) segment;
    # max over VALID entries only (shared per dst row -> exact softmax, no invalid dominance)
    m = jnp.max(jnp.where(maskb, logits, -1e30), axis=-1, keepdims=True)      # [N, 1]
    p = jnp.where(maskb, jnp.exp(logits - m), 0.0)                            # [N, K]
    s_seg = jnp.dot(p, segsum, preferred_element_type=jnp.float32)            # [N, E*H] per-(e,h) denom
    s_big = jnp.dot(s_seg, segexp, preferred_element_type=jnp.float32)        # [N, K]
    alpha = p * pl.reciprocal(jnp.maximum(s_big, 1e-16), approx=True)         # rows w/o edges -> 0

    # ONE block-diagonal aggregation matmul (K=128):
    #   X_big[k*N+j, e*C+c] = xp[j, c] * head_mask[h, c] * (e-block placement)
    xw = jnp.dot(xp, dup, preferred_element_type=jnp.float32)                 # [N, E*C] = [xp | xp]
    x_big = jnp.dot(xrep, xw, preferred_element_type=jnp.float32) * hmsel     # [K, E*C]
    outp = jnp.dot(alpha, x_big, preferred_element_type=jnp.float32)          # [N, E*C] lane-packed out_e
    outp = jnp.maximum(outp, 0.0)                                             # F.relu per metapath

    # 3. semantic attention across edge types, lane-packed
    ksem = jnp.tanh(jnp.dot(outp, wk_bd, preferred_element_type=jnp.float32) + bk_w)  # [N, E*C]
    t = jnp.dot(ksem * q_w, blocksum, preferred_element_type=jnp.float32)             # [N, E]
    scores = jnp.sum(t, axis=0, keepdims=True) * (1.0 / n)                            # [1, E]
    scores = scores - jnp.max(scores, axis=-1, keepdims=True)
    es = jnp.exp(scores)
    beta = es / jnp.sum(es, axis=-1, keepdims=True)                                   # [1, E]

    out = outp[:, 0:C] * beta[0:1, 0:1]
    for e in range(1, E):                                                     # E=2, static unroll
        out = out + outp[:, e * C:(e + 1) * C] * beta[0:1, e:e + 1]
    return out                                                                # [N, C]


def han2_kernel(x_ref, mask_ref, lanesel_ref, xrep_ref, hmsel_ref, segsum_ref,
                segexp_ref, dup_ref, blocksum_ref,
                wp1_ref, bp1_ref, ab1_ref, wk1_ref, bk1_ref, q1_ref,
                wp2_ref, bp2_ref, ab2_ref, wk2_ref, bk2_ref, q2_ref,
                out_ref):
    x = x_ref[...]                                                            # [N, C]
    n = x.shape[0]
    shared = (mask_ref[...] > 0.5,            # [N, K] bool mask, computed once, shared by both layers
              lanesel_ref[...], xrep_ref[...], hmsel_ref[...],
              segsum_ref[...], segexp_ref[...], dup_ref[...], blocksum_ref[...],
              jnp.ones((n, n), jnp.float32))
    h1 = _han_layer(x, shared, wp1_ref[...], bp1_ref[...], ab1_ref[...],
                    wk1_ref[...], bk1_ref[...], q1_ref[...])
    h2 = _han_layer(h1, shared, wp2_ref[...], bp2_ref[...], ab2_ref[...],
                    wk2_ref[...], bk2_ref[...], q2_ref[...])
    out_ref[...] = h2


# ------------------------------ wrapper ------------------------------
def _head_mask():
    # [HEADS, C]: row h is 1.0 on columns h*D:(h+1)*D, 0 elsewhere.
    return (jnp.arange(C)[None, :] // D == jnp.arange(HEADS)[:, None]).astype(jnp.float32)


def _shared_operands(adj):
    """Shape-static operands built in the wrapper (keeps relayouts out of the kernel)."""
    eye_n = jnp.eye(N, dtype=jnp.float32)
    lanesel = jnp.tile(eye_n, (1, E * HEADS))                         # [N, K]   LaneSel[j', k*N+j] = (j'==j)
    xrep = jnp.tile(eye_n, (E * HEADS, 1))                            # [K, N]   XRep[k*N+j, j']   = (j==j')
    hm = _head_mask()                                                 # [H, C]
    rows = []
    for e in range(E):
        for h in range(HEADS):
            rows.append(jnp.zeros((E, C), jnp.float32).at[e].set(hm[h]).reshape(1, E * C))
    hmsel = jnp.repeat(jnp.concatenate(rows, axis=0), N, axis=0)      # [K, E*C] head / metapath placement
    segsum = jnp.repeat(jnp.eye(E * HEADS, dtype=jnp.float32), N, axis=0)   # [K, E*H]
    segexp = segsum.T                                                 # [E*H, K]
    dup = jnp.tile(jnp.eye(C, dtype=jnp.float32), (1, E))             # [C, E*C]  xp -> [xp | xp]
    blocksum = jnp.repeat(jnp.eye(E, dtype=jnp.float32), C, axis=0)   # [E*C, E]
    # per-(e, h)-tiled adjacency mask: mask_big[i, k*N+j] = adj[e(k), i, j]
    mask_big = jnp.transpose(jnp.repeat(adj, HEADS, axis=0), (1, 0, 2)).reshape(N, K)
    return mask_big, lanesel, xrep, hmsel, segsum, segexp, dup, blocksum


def _prep_layer(params):
    """Block-diagonal / lane-replicated parameter matrices for one HANConv layer."""
    wp, bp, asrc, adst, wk, bk, q = params
    hm = _head_mask()
    a_src_bd = (asrc[:, None, :] * hm[None, :, :]).reshape(E * HEADS, C)      # row k = attn_src[e] ⊙ head h
    a_dst_bd = (adst[:, None, :] * hm[None, :, :]).reshape(E * HEADS, C)
    a_dst_big = jnp.repeat(a_dst_bd, N, axis=0).T                             # [C, K]  col k*N+j = a_dst row k
    a_src_big = jnp.repeat(a_src_bd, N, axis=0).T                             # [C, K]
    a_both = jnp.concatenate([a_dst_big, a_src_big], axis=1)                  # [C, 2K]
    wk_bd = jnp.kron(jnp.eye(E, dtype=jnp.float32), wk)                       # [E*C, E*C] blockdiag(wk, wk)
    bk_w = jnp.tile(bk, (1, E))                                               # [1, E*C]
    q_w = jnp.tile(q, (1, E))                                                 # [1, E*C]
    return wp, bp, a_both, wk_bd, bk_w, q_w


@jax.jit
def han_forward(x, adj, params_l1, params_l2):
    """HAN.forward: two stacked HANConv layers fused into ONE pallas_call."""
    n, c = x.shape
    shared = _shared_operands(adj)
    p1 = _prep_layer(params_l1)
    p2 = _prep_layer(params_l2)
    args = (x,) + shared + p1 + p2
    # Single invocation, no grid: all operands fit trivially in VMEM (<0.25 MiB).
    # NOTE: for real graph sizes, tile dst nodes over a "parallel" grid axis, batch
    # graphs to fill lanes / the second TensorCore on v7x, and set
    # pltpu.CompilerParams(vmem_limit_bytes=...) when tiles exceed the default
    # scoped limit (16 MiB on v5e, 32 MiB on v6e/v7x, with v7x VMEM halved).
    return pl.pallas_call(
        han2_kernel,
        out_shape=jax.ShapeDtypeStruct((n, c), jnp.float32),
    )(*args)


# --------------------------- parameter init ---------------------------
def init_hanconv_params(key):
    ks = jax.random.split(key, 7)
    scale = 1.0 / jnp.sqrt(jnp.float32(C))
    wp = jax.random.normal(ks[0], (C, C), jnp.float32) * scale     # proj weight
    bp = jnp.zeros((1, C), jnp.float32)                            # proj bias
    asrc = jax.random.normal(ks[1], (E, C), jnp.float32) * scale   # attn vec (src), [E, H*D]
    adst = jax.random.normal(ks[2], (E, C), jnp.float32) * scale   # attn vec (dst)
    wk = jax.random.normal(ks[3], (C, C), jnp.float32) * scale     # k_lin weight
    bk = jnp.zeros((1, C), jnp.float32)                            # k_lin bias
    q = jax.random.normal(ks[4], (1, C), jnp.float32) * scale      # semantic query
    return (wp, bp, asrc, adst, wk, bk, q)


if __name__ == "__main__":
    key = jax.random.PRNGKey(0)
    k_x, k_adj, k_p1, k_p2 = jax.random.split(key, 4)

    # node features, single node type
    x = jax.random.normal(k_x, (N, C), jnp.float32)

    # dense adjacency masks per edge type (metapath), with self-loops added
    adj = (jax.random.uniform(k_adj, (E, N, N)) < 0.3).astype(jnp.float32)
    eye = jnp.eye(N, dtype=jnp.float32)[None, :, :]
    adj = jnp.maximum(adj, jnp.broadcast_to(eye, adj.shape))

    params_l1 = init_hanconv_params(k_p1)
    params_l2 = init_hanconv_params(k_p2)

    out = han_forward(x, adj, params_l1, params_l2)
    out = jax.block_until_ready(out)
    assert out.shape == (N, C) and out.dtype == jnp.float32
    assert bool(jnp.all(jnp.isfinite(out)))
    print("KERNEL_OK")
</pallas_src>

<mosaic_0001>
module attributes {stable_mosaic.version = 11 : i64} {
  func.func @han2_kernel(%arg0: memref<16x32xf32, #tpu.memory_space<vmem>>, %arg1: memref<16x128xf32, #tpu.memory_space<vmem>>, %arg2: memref<16x128xf32, #tpu.memory_space<vmem>>, %arg3: memref<128x16xf32, #tpu.memory_space<vmem>>, %arg4: memref<128x64xf32, #tpu.memory_space<vmem>>, %arg5: memref<128x8xf32, #tpu.memory_space<vmem>>, %arg6: memref<8x128xf32, #tpu.memory_space<vmem>>, %arg7: memref<32x64xf32, #tpu.memory_space<vmem>>, %arg8: memref<64x2xf32, #tpu.memory_space<vmem>>, %arg9: memref<32x32xf32, #tpu.memory_space<vmem>>, %arg10: memref<1x32xf32, #tpu.memory_space<vmem>>, %arg11: memref<32x256xf32, #tpu.memory_space<vmem>>, %arg12: memref<64x64xf32, #tpu.memory_space<vmem>>, %arg13: memref<1x64xf32, #tpu.memory_space<vmem>>, %arg14: memref<1x64xf32, #tpu.memory_space<vmem>>, %arg15: memref<32x32xf32, #tpu.memory_space<vmem>>, %arg16: memref<1x32xf32, #tpu.memory_space<vmem>>, %arg17: memref<32x256xf32, #tpu.memory_space<vmem>>, %arg18: memref<64x64xf32, #tpu.memory_space<vmem>>, %arg19: memref<1x64xf32, #tpu.memory_space<vmem>>, %arg20: memref<1x64xf32, #tpu.memory_space<vmem>>, %arg21: memref<16x32xf32, #tpu.memory_space<vmem>>) attributes {dimension_semantics = [], scalar_prefetch = 0 : i64, scratch_operands = 0 : i64, tpu.core_type = #tpu.core_type<tc>} {
    %c0 = arith.constant 0 : index
    %c0_0 = arith.constant 0 : index
    %0 = vector.load %arg0[%c0, %c0_0] : memref<16x32xf32, #tpu.memory_space<vmem>>, vector<16x32xf32>
    %c0_1 = arith.constant 0 : index
    %c0_2 = arith.constant 0 : index
    %1 = vector.load %arg1[%c0_1, %c0_2] : memref<16x128xf32, #tpu.memory_space<vmem>>, vector<16x128xf32>
    %cst = arith.constant 5.000000e-01 : f32
    %2 = vector.broadcast %cst : f32 to vector<16x128xf32>
    %3 = arith.cmpf ogt, %1, %2 : vector<16x128xf32>
    %c0_3 = arith.constant 0 : index
    %c0_4 = arith.constant 0 : index
    %4 = vector.load %arg2[%c0_3, %c0_4] : memref<16x128xf32, #tpu.memory_space<vmem>>, vector<16x128xf32>
    %c0_5 = arith.constant 0 : index
    %c0_6 = arith.constant 0 : index
    %5 = vector.load %arg3[%c0_5, %c0_6] : memref<128x16xf32, #tpu.memory_space<vmem>>, vector<128x16xf32>
    %c0_7 = arith.constant 0 : index
    %c0_8 = arith.constant 0 : index
    %6 = vector.load %arg4[%c0_7, %c0_8] : memref<128x64xf32, #tpu.memory_space<vmem>>, vector<128x64xf32>
    %c0_9 = arith.constant 0 : index
    %c0_10 = arith.constant 0 : index
    %7 = vector.load %arg5[%c0_9, %c0_10] : memref<128x8xf32, #tpu.memory_space<vmem>>, vector<128x8xf32>
    %c0_11 = arith.constant 0 : index
    %c0_12 = arith.constant 0 : index
    %8 = vector.load %arg6[%c0_11, %c0_12] : memref<8x128xf32, #tpu.memory_space<vmem>>, vector<8x128xf32>
    %c0_13 = arith.constant 0 : index
    %c0_14 = arith.constant 0 : index
    %9 = vector.load %arg7[%c0_13, %c0_14] : memref<32x64xf32, #tpu.memory_space<vmem>>, vector<32x64xf32>
    %c0_15 = arith.constant 0 : index
    %c0_16 = arith.constant 0 : index
    %10 = vector.load %arg8[%c0_15, %c0_16] : memref<64x2xf32, #tpu.memory_space<vmem>>, vector<64x2xf32>
    %cst_17 = arith.constant 1.000000e+00 : f32
    %11 = vector.broadcast %cst_17 : f32 to vector<16x16xf32>
    %c0_18 = arith.constant 0 : index
    %c0_19 = arith.constant 0 : index
    %12 = vector.load %arg9[%c0_18, %c0_19] : memref<32x32xf32, #tpu.memory_space<vmem>>, vector<32x32xf32>
    %c0_20 = arith.constant 0 : index
    %c0_21 = arith.constant 0 : index
    %13 = vector.load %arg10[%c0_20, %c0_21] : memref<1x32xf32, #tpu.memory_space<vmem>>, vector<1x32xf32>
    %c0_22 = arith.constant 0 : index
    %c0_23 = arith.constant 0 : index
    %14 = vector.load %arg11[%c0_22, %c0_23] : memref<32x256xf32, #tpu.memory_space<vmem>>, vector<32x256xf32>
    %c0_24 = arith.constant 0 : index
    %c0_25 = arith.constant 0 : index
    %15 = vector.load %arg12[%c0_24, %c0_25] : memref<64x64xf32, #tpu.memory_space<vmem>>, vector<64x64xf32>
    %c0_26 = arith.constant 0 : index
    %c0_27 = arith.constant 0 : index
    %16 = vector.load %arg13[%c0_26, %c0_27] : memref<1x64xf32, #tpu.memory_space<vmem>>, vector<1x64xf32>
    %c0_28 = arith.constant 0 : index
    %c0_29 = arith.constant 0 : index
    %17 = vector.load %arg14[%c0_28, %c0_29] : memref<1x64xf32, #tpu.memory_space<vmem>>, vector<1x64xf32>
    %cst_30 = arith.constant dense<0.000000e+00> : vector<16x32xf32>
    %18 = tpu.matmul %0, %12, %cst_30 {dimension_numbers = #tpu.dot_dimension_numbers<[1], [0], [0], [1], [0, 0, 1, 1], [], []>} : vector<16x32xf32>, vector<32x32xf32>, vector<16x32xf32> -> vector<16x32xf32>
    %19 = vector.broadcast %13 : vector<1x32xf32> to vector<16x32xf32>
    %20 = arith.addf %18, %19 : vector<16x32xf32>
    %cst_31 = arith.constant dense<0.000000e+00> : vector<16x256xf32>
    %21 = tpu.matmul %20, %14, %cst_31 {dimension_numbers = #tpu.dot_dimension_numbers<[1], [0], [0], [1], [0, 0, 1, 1], [], []>} : vector<16x32xf32>, vector<32x256xf32>, vector<16x256xf32> -> vector<16x256xf32>
    %22 = vector.extract_strided_slice %21 {offsets = [0, 0], sizes = [16, 128], strides = [1, 1]} : vector<16x256xf32> to vector<16x128xf32>
    %23 = vector.extract_strided_slice %21 {offsets = [0, 128], sizes = [16, 128], strides = [1, 1]} : vector<16x256xf32> to vector<16x128xf32>
    %24 = arith.mulf %23, %4 : vector<16x128xf32>
    %cst_32 = arith.constant dense<0.000000e+00> : vector<16x128xf32>
    %25 = tpu.matmul %11, %24, %cst_32 {dimension_numbers = #tpu.dot_dimension_numbers<[1], [0], [0], [1], [0, 0, 1, 1], [], []>} : vector<16x16xf32>, vector<16x128xf32>, vector<16x128xf32> -> vector<16x128xf32>
    %26 = arith.addf %22, %25 : vector<16x128xf32>
    %cst_33 = arith.constant 2.000000e-01 : f32
    %27 = vector.broadcast %cst_33 : f32 to vector<16x128xf32>
    %28 = arith.mulf %27, %26 : vector<16x128xf32>
    %29 = arith.maximumf %26, %28 : vector<16x128xf32>
    %cst_34 = arith.constant -1.000000e+30 : f32
    %30 = vector.broadcast %cst_34 : f32 to vector<16x128xf32>
    %31 = arith.select %3, %29, %30 : vector<16x128xi1>, vector<16x128xf32>
    %cst_35 = arith.constant dense<0xFF800000> : vector<16xf32>
    %32 = vector.multi_reduction <maximumf>, %31, %cst_35 [1] : vector<16x128xf32> to vector<16xf32>
    %33 = vector.shape_cast %32 : vector<16xf32> to vector<16x1xf32>
    %34 = vector.broadcast %33 : vector<16x1xf32> to vector<16x128xf32>
    %35 = arith.subf %29, %34 : vector<16x128xf32>
    %36 = math.exp %35 : vector<16x128xf32>
    %cst_36 = arith.constant 0.000000e+00 : f32
    %37 = vector.broadcast %cst_36 : f32 to vector<16x128xf32>
    %38 = arith.select %3, %36, %37 : vector<16x128xi1>, vector<16x128xf32>
    %cst_37 = arith.constant dense<0.000000e+00> : vector<16x8xf32>
    %39 = tpu.matmul %38, %7, %cst_37 {dimension_numbers = #tpu.dot_dimension_numbers<[1], [0], [0], [1], [0, 0, 1, 1], [], []>} : vector<16x128xf32>, vector<128x8xf32>, vector<16x8xf32> -> vector<16x8xf32>
    %cst_38 = arith.constant dense<0.000000e+00> : vector<16x128xf32>
    %40 = tpu.matmul %39, %8, %cst_38 {dimension_numbers = #tpu.dot_dimension_numbers<[1], [0], [0], [1], [0, 0, 1, 1], [], []>} : vector<16x8xf32>, vector<8x128xf32>, vector<16x128xf32> -> vector<16x128xf32>
    %cst_39 = arith.constant 1.000000e-16 : f32
    %41 = vector.broadcast %cst_39 : f32 to vector<16x128xf32>
    %42 = arith.maximumf %40, %41 : vector<16x128xf32>
    %43 = tpu.reciprocal %42 {approx = true} : vector<16x128xf32> -> vector<16x128xf32>
    %44 = arith.mulf %38, %43 : vector<16x128xf32>
    %cst_40 = arith.constant dense<0.000000e+00> : vector<16x64xf32>
    %45 = tpu.matmul %20, %9, %cst_40 {dimension_numbers = #tpu.dot_dimension_numbers<[1], [0], [0], [1], [0, 0, 1, 1], [], []>} : vector<16x32xf32>, vector<32x64xf32>, vector<16x64xf32> -> vector<16x64xf32>
    %cst_41 = arith.constant dense<0.000000e+00> : vector<128x64xf32>
    %46 = tpu.matmul %5, %45, %cst_41 {dimension_numbers = #tpu.dot_dimension_numbers<[1], [0], [0], [1], [0, 0, 1, 1], [], []>} : vector<128x16xf32>, vector<16x64xf32>, vector<128x64xf32> -> vector<128x64xf32>
    %47 = arith.mulf %46, %6 : vector<128x64xf32>
    %cst_42 = arith.constant dense<0.000000e+00> : vector<16x64xf32>
    %48 = tpu.matmul %44, %47, %cst_42 {dimension_numbers = #tpu.dot_dimension_numbers<[1], [0], [0], [1], [0, 0, 1, 1], [], []>} : vector<16x128xf32>, vector<128x64xf32>, vector<16x64xf32> -> vector<16x64xf32>
    %cst_43 = arith.constant 0.000000e+00 : f32
    %49 = vector.broadcast %cst_43 : f32 to vector<16x64xf32>
    %50 = arith.maximumf %48, %49 : vector<16x64xf32>
    %cst_44 = arith.constant dense<0.000000e+00> : vector<16x64xf32>
    %51 = tpu.matmul %50, %15, %cst_44 {dimension_numbers = #tpu.dot_dimension_numbers<[1], [0], [0], [1], [0, 0, 1, 1], [], []>} : vector<16x64xf32>, vector<64x64xf32>, vector<16x64xf32> -> vector<16x64xf32>
    %52 = vector.broadcast %16 : vector<1x64xf32> to vector<16x64xf32>
    %53 = arith.addf %51, %52 : vector<16x64xf32>
    %54 = math.tanh %53 : vector<16x64xf32>
    %55 = vector.broadcast %17 : vector<1x64xf32> to vector<16x64xf32>
    %56 = arith.mulf %54, %55 : vector<16x64xf32>
    %cst_45 = arith.constant dense<0.000000e+00> : vector<16x2xf32>
    %57 = tpu.matmul %56, %10, %cst_45 {dimension_numbers = #tpu.dot_dimension_numbers<[1], [0], [0], [1], [0, 0, 1, 1], [], []>} : vector<16x64xf32>, vector<64x2xf32>, vector<16x2xf32> -> vector<16x2xf32>
    %cst_46 = arith.constant dense<0.000000e+00> : vector<2xf32>
    %58 = vector.multi_reduction <add>, %57, %cst_46 [0] : vector<16x2xf32> to vector<2xf32>
    %59 = vector.shape_cast %58 : vector<2xf32> to vector<1x2xf32>
    %cst_47 = arith.constant 6.250000e-02 : f32
    %60 = vector.broadcast %cst_47 : f32 to vector<1x2xf32>
    %61 = arith.mulf %59, %60 : vector<1x2xf32>
    %cst_48 = arith.constant dense<0xFF800000> : vector<1xf32>
    %62 = vector.multi_reduction <maximumf>, %61, %cst_48 [1] : vector<1x2xf32> to vector<1xf32>
    %63 = vector.shape_cast %62 : vector<1xf32> to vector<1x1xf32>
    %64 = vector.broadcast %63 : vector<1x1xf32> to vector<1x2xf32>
    %65 = arith.subf %61, %64 : vector<1x2xf32>
    %66 = math.exp %65 : vector<1x2xf32>
    %cst_49 = arith.constant dense<0.000000e+00> : vector<1xf32>
    %67 = vector.multi_reduction <add>, %66, %cst_49 [1] : vector<1x2xf32> to vector<1xf32>
    %68 = vector.shape_cast %67 : vector<1xf32> to vector<1x1xf32>
    %69 = vector.broadcast %68 : vector<1x1xf32> to vector<1x2xf32>
    %70 = arith.divf %66, %69 : vector<1x2xf32>
    %71 = vector.extract_strided_slice %50 {offsets = [0, 0], sizes = [16, 32], strides = [1, 1]} : vector<16x64xf32> to vector<16x32xf32>
    %72 = vector.extract_strided_slice %70 {offsets = [0, 0], sizes = [1, 1], strides = [1, 1]} : vector<1x2xf32> to vector<1x1xf32>
    %73 = vector.broadcast %72 : vector<1x1xf32> to vector<16x32xf32>
    %74 = arith.mulf %71, %73 : vector<16x32xf32>
    %75 = vector.extract_strided_slice %50 {offsets = [0, 32], sizes = [16, 32], strides = [1, 1]} : vector<16x64xf32> to vector<16x32xf32>
    %76 = vector.extract_strided_slice %70 {offsets = [0, 1], sizes = [1, 1], strides = [1, 1]} : vector<1x2xf32> to vector<1x1xf32>
    %77 = vector.broadcast %76 : vector<1x1xf32> to vector<16x32xf32>
    %78 = arith.mulf %75, %77 : vector<16x32xf32>
    %79 = arith.addf %74, %78 : vector<16x32xf32>
    %c0_50 = arith.constant 0 : index
    %c0_51 = arith.constant 0 : index
    %80 = vector.load %arg15[%c0_50, %c0_51] : memref<32x32xf32, #tpu.memory_space<vmem>>, vector<32x32xf32>
    %c0_52 = arith.constant 0 : index
    %c0_53 = arith.constant 0 : index
    %81 = vector.load %arg16[%c0_52, %c0_53] : memref<1x32xf32, #tpu.memory_space<vmem>>, vector<1x32xf32>
    %c0_54 = arith.constant 0 : index
    %c0_55 = arith.constant 0 : index
    %82 = vector.load %arg17[%c0_54, %c0_55] : memref<32x256xf32, #tpu.memory_space<vmem>>, vector<32x256xf32>
    %c0_56 = arith.constant 0 : index
    %c0_57 = arith.constant 0 : index
    %83 = vector.load %arg18[%c0_56, %c0_57] : memref<64x64xf32, #tpu.memory_space<vmem>>, vector<64x64xf32>
    %c0_58 = arith.constant 0 : index
    %c0_59 = arith.constant 0 : index
    %84 = vector.load %arg19[%c0_58, %c0_59] : memref<1x64xf32, #tpu.memory_space<vmem>>, vector<1x64xf32>
    %c0_60 = arith.constant 0 : index
    %c0_61 = arith.constant 0 : index
    %85 = vector.load %arg20[%c0_60, %c0_61] : memref<1x64xf32, #tpu.memory_space<vmem>>, vector<1x64xf32>
    %cst_62 = arith.constant dense<0.000000e+00> : vector<16x32xf32>
    %86 = tpu.matmul %79, %80, %cst_62 {dimension_numbers = #tpu.dot_dimension_numbers<[1], [0], [0], [1], [0, 0, 1, 1], [], []>} : vector<16x32xf32>, vector<32x32xf32>, vector<16x32xf32> -> vector<16x32xf32>
    %87 = vector.broadcast %81 : vector<1x32xf32> to vector<16x32xf32>
    %88 = arith.addf %86, %87 : vector<16x32xf32>
    %cst_63 = arith.constant dense<0.000000e+00> : vector<16x256xf32>
    %89 = tpu.matmul %88, %82, %cst_63 {dimension_numbers = #tpu.dot_dimension_numbers<[1], [0], [0], [1], [0, 0, 1, 1], [], []>} : vector<16x32xf32>, vector<32x256xf32>, vector<16x256xf32> -> vector<16x256xf32>
    %90 = vector.extract_strided_slice %89 {offsets = [0, 0], sizes = [16, 128], strides = [1, 1]} : vector<16x256xf32> to vector<16x128xf32>
    %91 = vector.extract_strided_slice %89 {offsets = [0, 128], sizes = [16, 128], strides = [1, 1]} : vector<16x256xf32> to vector<16x128xf32>
    %92 = arith.mulf %91, %4 : vector<16x128xf32>
    %cst_64 = arith.constant dense<0.000000e+00> : vector<16x128xf32>
    %93 = tpu.matmul %11, %92, %cst_64 {dimension_numbers = #tpu.dot_dimension_numbers<[1], [0], [0], [1], [0, 0, 1, 1], [], []>} : vector<16x16xf32>, vector<16x128xf32>, vector<16x128xf32> -> vector<16x128xf32>
    %94 = arith.addf %90, %93 : vector<16x128xf32>
    %cst_65 = arith.constant 2.000000e-01 : f32
    %95 = vector.broadcast %cst_65 : f32 to vector<16x128xf32>
    %96 = arith.mulf %95, %94 : vector<16x128xf32>
    %97 = arith.maximumf %94, %96 : vector<16x128xf32>
    %cst_66 = arith.constant -1.000000e+30 : f32
    %98 = vector.broadcast %cst_66 : f32 to vector<16x128xf32>
    %99 = arith.select %3, %97, %98 : vector<16x128xi1>, vector<16x128xf32>
    %cst_67 = arith.constant dense<0xFF800000> : vector<16xf32>
    %100 = vector.multi_reduction <maximumf>, %99, %cst_67 [1] : vector<16x128xf32> to vector<16xf32>
    %101 = vector.shape_cast %100 : vector<16xf32> to vector<16x1xf32>
    %102 = vector.broadcast %101 : vector<16x1xf32> to vector<16x128xf32>
    %103 = arith.subf %97, %102 : vector<16x128xf32>
    %104 = math.exp %103 : vector<16x128xf32>
    %cst_68 = arith.constant 0.000000e+00 : f32
    %105 = vector.broadcast %cst_68 : f32 to vector<16x128xf32>
    %106 = arith.select %3, %104, %105 : vector<16x128xi1>, vector<16x128xf32>
    %cst_69 = arith.constant dense<0.000000e+00> : vector<16x8xf32>
    %107 = tpu.matmul %106, %7, %cst_69 {dimension_numbers = #tpu.dot_dimension_numbers<[1], [0], [0], [1], [0, 0, 1, 1], [], []>} : vector<16x128xf32>, vector<128x8xf32>, vector<16x8xf32> -> vector<16x8xf32>
    %cst_70 = arith.constant dense<0.000000e+00> : vector<16x128xf32>
    %108 = tpu.matmul %107, %8, %cst_70 {dimension_numbers = #tpu.dot_dimension_numbers<[1], [0], [0], [1], [0, 0, 1, 1], [], []>} : vector<16x8xf32>, vector<8x128xf32>, vector<16x128xf32> -> vector<16x128xf32>
    %cst_71 = arith.constant 1.000000e-16 : f32
    %109 = vector.broadcast %cst_71 : f32 to vector<16x128xf32>
    %110 = arith.maximumf %108, %109 : vector<16x128xf32>
    %111 = tpu.reciprocal %110 {approx = true} : vector<16x128xf32> -> vector<16x128xf32>
    %112 = arith.mulf %106, %111 : vector<16x128xf32>
    %cst_72 = arith.constant dense<0.000000e+00> : vector<16x64xf32>
    %113 = tpu.matmul %88, %9, %cst_72 {dimension_numbers = #tpu.dot_dimension_numbers<[1], [0], [0], [1], [0, 0, 1, 1], [], []>} : vector<16x32xf32>, vector<32x64xf32>, vector<16x64xf32> -> vector<16x64xf32>
    %cst_73 = arith.constant dense<0.000000e+00> : vector<128x64xf32>
    %114 = tpu.matmul %5, %113, %cst_73 {dimension_numbers = #tpu.dot_dimension_numbers<[1], [0], [0], [1], [0, 0, 1, 1], [], []>} : vector<128x16xf32>, vector<16x64xf32>, vector<128x64xf32> -> vector<128x64xf32>
    %115 = arith.mulf %114, %6 : vector<128x64xf32>
    %cst_74 = arith.constant dense<0.000000e+00> : vector<16x64xf32>
    %116 = tpu.matmul %112, %115, %cst_74 {dimension_numbers = #tpu.dot_dimension_numbers<[1], [0], [0], [1], [0, 0, 1, 1], [], []>} : vector<16x128xf32>, vector<128x64xf32>, vector<16x64xf32> -> vector<16x64xf32>
    %cst_75 = arith.constant 0.000000e+00 : f32
    %117 = vector.broadcast %cst_75 : f32 to vector<16x64xf32>
    %118 = arith.maximumf %116, %117 : vector<16x64xf32>
    %cst_76 = arith.constant dense<0.000000e+00> : vector<16x64xf32>
    %119 = tpu.matmul %118, %83, %cst_76 {dimension_numbers = #tpu.dot_dimension_numbers<[1], [0], [0], [1], [0, 0, 1, 1], [], []>} : vector<16x64xf32>, vector<64x64xf32>, vector<16x64xf32> -> vector<16x64xf32>
    %120 = vector.broadcast %84 : vector<1x64xf32> to vector<16x64xf32>
    %121 = arith.addf %119, %120 : vector<16x64xf32>
    %122 = math.tanh %121 : vector<16x64xf32>
    %123 = vector.broadcast %85 : vector<1x64xf32> to vector<16x64xf32>
    %124 = arith.mulf %122, %123 : vector<16x64xf32>
    %cst_77 = arith.constant dense<0.000000e+00> : vector<16x2xf32>
    %125 = tpu.matmul %124, %10, %cst_77 {dimension_numbers = #tpu.dot_dimension_numbers<[1], [0], [0], [1], [0, 0, 1, 1], [], []>} : vector<16x64xf32>, vector<64x2xf32>, vector<16x2xf32> -> vector<16x2xf32>
    %cst_78 = arith.constant dense<0.000000e+00> : vector<2xf32>
    %126 = vector.multi_reduction <add>, %125, %cst_78 [0] : vector<16x2xf32> to vector<2xf32>
    %127 = vector.shape_cast %126 : vector<2xf32> to vector<1x2xf32>
    %cst_79 = arith.constant 6.250000e-02 : f32
    %128 = vector.broadcast %cst_79 : f32 to vector<1x2xf32>
    %129 = arith.mulf %127, %128 : vector<1x2xf32>
    %cst_80 = arith.constant dense<0xFF800000> : vector<1xf32>
    %130 = vector.multi_reduction <maximumf>, %129, %cst_80 [1] : vector<1x2xf32> to vector<1xf32>
    %131 = vector.shape_cast %130 : vector<1xf32> to vector<1x1xf32>
    %132 = vector.broadcast %131 : vector<1x1xf32> to vector<1x2xf32>
    %133 = arith.subf %129, %132 : vector<1x2xf32>
    %134 = math.exp %133 : vector<1x2xf32>
    %cst_81 = arith.constant dense<0.000000e+00> : vector<1xf32>
    %135 = vector.multi_reduction <add>, %134, %cst_81 [1] : vector<1x2xf32> to vector<1xf32>
    %136 = vector.shape_cast %135 : vector<1xf32> to vector<1x1xf32>
    %137 = vector.broadcast %136 : vector<1x1xf32> to vector<1x2xf32>
    %138 = arith.divf %134, %137 : vector<1x2xf32>
    %139 = vector.extract_strided_slice %118 {offsets = [0, 0], sizes = [16, 32], strides = [1, 1]} : vector<16x64xf32> to vector<16x32xf32>
    %140 = vector.extract_strided_slice %138 {offsets = [0, 0], sizes = [1, 1], strides = [1, 1]} : vector<1x2xf32> to vector<1x1xf32>
    %141 = vector.broadcast %140 : vector<1x1xf32> to vector<16x32xf32>
    %142 = arith.mulf %139, %141 : vector<16x32xf32>
    %143 = vector.extract_strided_slice %118 {offsets = [0, 32], sizes = [16, 32], strides = [1, 1]} : vector<16x64xf32> to vector<16x32xf32>
    %144 = vector.extract_strided_slice %138 {offsets = [0, 1], sizes = [1, 1], strides = [1, 1]} : vector<1x2xf32> to vector<1x1xf32>
    %145 = vector.broadcast %144 : vector<1x1xf32> to vector<16x32xf32>
    %146 = arith.mulf %143, %145 : vector<16x32xf32>
    %147 = arith.addf %142, %146 : vector<16x32xf32>
    %c0_82 = arith.constant 0 : index
    %c0_83 = arith.constant 0 : index
    %148 = vector.load %arg21[%c0_82, %c0_83] : memref<16x32xf32, #tpu.memory_space<vmem>>, vector<16x32xf32>
    tpu.vector_store %arg21[%c0_82, %c0_83], %147 {strides = array<i32>} : memref<16x32xf32, #tpu.memory_space<vmem>>, vector<16x32xf32>,
    return
  }
}

</mosaic_0001>

<bundles_post_ra>
// kernel: tile.39
= control target key start
LH: loop header
LB: loop body
LE: loop exit
PB: predicated region body
PF: predicated region fallthrough
CT: control target
= control target key end

     0   :  { %vm4_vm0 = vcmask 1047556   ;;  %s209_s14 = smov 96   ;;  %s210_s19 = smov 112   ;;  %vm6_vm1 = vcmask 130048   ;;  %vm25_vm2 = vcmask 1048448   ;;  %vm46_vm3 = vcmask 917248   ;;  %s388_s0 = inlined_call_operand.vmem [shape: f32[16,8,16], index: 0, kind: input, shape index: {}]   ;;  %s389_s1 = inlined_call_operand.vmem [shape: f32[16,128], index: 1, kind: output, shape index: {}]  }
   0x1   :  { %v172_v0 = vld [vmem:[%s388_s0 + $0x6] ss:$8 sm:$0xf]   ;;  %v167_v3 = vld [vmem:[%s388_s0 + $0x7] ss:$8 sm:$0xf]  }
   0x2   :  { %v173_v1 = vld [vmem:[%s388_s0 + $0x6] ss:$8 sm:$0xf0]   ;;  %v168_v4 = vld [vmem:[%s388_s0 + $0x7] ss:$8 sm:$0xf0]  }
   0x3   :  { %v43_v2 = vsel %vm4_vm0, %v173_v1, %v172_v0  ;;  %v22_v5 = vsel %vm4_vm0, %v168_v4, %v167_v3  ;;  %v174_v6 = vld [vmem:[%s388_s0 + $0x46] ss:$8 sm:$0xf]   ;;  %v169_v9 = vld [vmem:[%s388_s0 + $0x47] ss:$8 sm:$0xf]  }
   0x4   :  { %44 = vrot.lane.b32.xlu1 %v43_v2, %s209_s14  ;;  %v175_v7 = vld [vmem:[%s388_s0 + $0x46] ss:$8 sm:$0xf0]   ;;  %23 = vrot.lane.b32.xlu0 %v22_v5, %s210_s19  ;;  %v170_v10 = vld [vmem:[%s388_s0 + $0x47] ss:$8 sm:$0xf0]  }
   0x5   :  { %v53_v8 = vsel %vm4_vm0, %v175_v7, %v174_v6  ;;  %v32_v11 = vsel %vm4_vm0, %v170_v10, %v169_v9  ;;  %v179_v12 = vld [vmem:[%s388_s0 + $0x45] ss:$8 sm:$0xf]   ;;  %v184_v18 = vld [vmem:[%s388_s0 + $0x44] ss:$8 sm:$0xf]  }
   0x6   :  { %v180_v13 = vld [vmem:[%s388_s0 + $0x45] ss:$8 sm:$0xf0]   ;;  %v185_v19 = vld [vmem:[%s388_s0 + $0x44] ss:$8 sm:$0xf0]  }
   0x7   :  { %v177_v14 = vld [vmem:[%s388_s0 + $0x5] ss:$8 sm:$0xf]   ;;  %v74_v16 = vsel %vm4_vm0, %v180_v13, %v179_v12  ;;  %v182_v20 = vld [vmem:[%s388_s0 + $0x4] ss:$8 sm:$0xf]   ;;  %v95_v22 = vsel %vm4_vm0, %v185_v19, %v184_v18 }
   0x8   :  { %54 = vrot.lane.b32.xlu1 %v53_v8, %s209_s14  ;;  %v178_v15 = vld [vmem:[%s388_s0 + $0x5] ss:$8 sm:$0xf0]   ;;  %33 = vrot.lane.b32.xlu0 %v32_v11, %s210_s19  ;;  %v183_v21 = vld [vmem:[%s388_s0 + $0x4] ss:$8 sm:$0xf0]  }
   0x9   :  { %v64_v17 = vsel %vm4_vm0, %v178_v15, %v177_v14  ;;  %s211_s11 = smov 80   ;;  %v85_v23 = vsel %vm4_vm0, %v183_v21, %v182_v20  ;;  %v189_v24 = vld [vmem:[%s388_s0 + $0x43] ss:$8 sm:$0xf]   ;;  %s212_s20 = smov 64   ;;  %vm67_vm4 = vcmask 786048  }
   0xa   :  { %v190_v25 = vld [vmem:[%s388_s0 + $0x43] ss:$8 sm:$0xf0]   ;;  %v194_v28 = vld [vmem:[%s388_s0 + $0x42] ss:$8 sm:$0xf]  }
   0xb   :  { %v187_v26 = vld [vmem:[%s388_s0 + $0x3] ss:$8 sm:$0xf]   ;;  %v195_v29 = vld [vmem:[%s388_s0 + $0x42] ss:$8 sm:$0xf0]   ;;  %v116_v30 = vsel %vm4_vm0, %v190_v25, %v189_v24 }
   0xc   :  { %75 = vrot.lane.b32.xlu1 %v74_v16, %s211_s11  ;;  %65 = vrot.lane.b32.xlu0 %v64_v17, %s211_s11  ;;  %v188_v27 = vld [vmem:[%s388_s0 + $0x3] ss:$8 sm:$0xf0]   ;;  %v192_v31 = vld [vmem:[%s388_s0 + $0x2] ss:$8 sm:$0xf]   ;;  %v137_v40 = vsel %vm4_vm0, %v195_v29, %v194_v28 }
   0xd   :  { %v2_v32 = vld [vmem:[%s388_s0] ss:$8 sm:$0xf]   ;;  %v106_v33 = vsel %vm4_vm0, %v188_v27, %v187_v26  ;;  %v193_v36 = vld [vmem:[%s388_s0 + $0x2] ss:$8 sm:$0xf0]  }
   0xe   :  { %v3_v34 = vld [vmem:[%s388_s0] ss:$8 sm:$0xf0]   ;;  %s213_s8 = smov 48   ;;  %v127_v41 = vsel %vm4_vm0, %v193_v36, %v192_v31  ;;  %s215_s21 = smov 16   ;;  %vm88_vm5 = vcmask 654848  }
   0xf   :  { %v164_v35 = vld [vmem:[%s388_s0 + $0x40] ss:$8 sm:$0xf]   ;;  %v5_v37 = vsel %vm4_vm0, %v3_v34, %v2_v32  ;;  %v199_v42 = vld [vmem:[%s388_s0 + $0x41] ss:$8 sm:$0xf]  }
  0x10   :  { %96 = vrot.lane.b32.xlu1 %v95_v22, %s212_s20  ;;  %86 = vrot.lane.b32.xlu0 %v85_v23, %s212_s20  ;;  %v165_v38 = vld [vmem:[%s388_s0 + $0x40] ss:$8 sm:$0xf0]   ;;  %7 = vst.msk [vmem:[%s389_s1] sm:$0xff] %vm6_vm1, %v5_v37   ;;  %vm109_vm6 = vcmask 523648   ;;  %vm130_vm7 = vcmask 392448  }
  0x11   :  { %v13_v39 = vsel %vm4_vm0, %v165_v38, %v164_v35  ;;  %v200_v43 = vld [vmem:[%s388_s0 + $0x41] ss:$8 sm:$0xf0]   ;;  %vm151_vm8 = vcmask 261248  }
  0x12   :  { %166 = vst.msk [vmem:[%s389_s1 + $0x8] sm:$0xff] %vm6_vm1, %v13_v39   ;;  %v197_v44 = vld [vmem:[%s388_s0 + $0x1] ss:$8 sm:$0xf]   ;;  %v158_v46 = vsel %vm4_vm0, %v200_v43, %v199_v42 }
  0x13   :  { %v198_v45 = vld [vmem:[%s388_s0 + $0x1] ss:$8 sm:$0xf0]   ;;  %s214_s0 = smov 32  }
  0x14   :  { %117 = vrot.lane.b32.xlu1 %v116_v30, %s213_s8  ;;  %107 = vrot.lane.b32.xlu0 %v106_v33, %s213_s8  ;;  %v148_v47 = vsel %vm4_vm0, %v198_v45, %v197_v44 }
  0x18   :  { %138 = vrot.lane.b32.xlu1 %v137_v40, %s214_s0  ;;  %128 = vrot.lane.b32.xlu0 %v127_v41, %s214_s0 }
  0x1c   :  { %159 = vrot.lane.b32.xlu1 %v158_v46, %s215_s21  ;;  %149 = vrot.lane.b32.xlu0 %v148_v47, %s215_s21 }
  0x76   :  { %v45_v48 = vpop.permute.xlu1 %44   ;;  %v24_v49 = vpop.permute.xlu0 %23  }
  0x77   :  { %26 = vst.msk [vmem:[%s389_s1] sm:$0xff] %vm25_vm2, %v24_v49  }
  0x78   :  { %47 = vst.msk [vmem:[%s389_s1] sm:$0xff] %vm46_vm3, %v45_v48  }
  0x7a   :  { %v55_v50 = vpop.permute.xlu1 %54   ;;  %v34_v51 = vpop.permute.xlu0 %33  }
  0x7b   :  { %171 = vst.msk [vmem:[%s389_s1 + $0x8] sm:$0xff] %vm25_vm2, %v34_v51  }
  0x7c   :  { %176 = vst.msk [vmem:[%s389_s1 + $0x8] sm:$0xff] %vm46_vm3, %v55_v50  }
  0x7e   :  { %v76_v52 = vpop.permute.xlu1 %75   ;;  %v66_v53 = vpop.permute.xlu0 %65  }
  0x7f   :  { %181 = vst.msk [vmem:[%s389_s1 + $0x8] sm:$0xff] %vm67_vm4, %v76_v52   ;;  %68 = vst.msk [vmem:[%s389_s1] sm:$0xff] %vm67_vm4, %v66_v53  }
  0x82   :  { %v97_v54 = vpop.permute.xlu1 %96   ;;  %v87_v55 = vpop.permute.xlu0 %86  }
  0x83   :  { %186 = vst.msk [vmem:[%s389_s1 + $0x8] sm:$0xff] %vm88_vm5, %v97_v54   ;;  %89 = vst.msk [vmem:[%s389_s1] sm:$0xff] %vm88_vm5, %v87_v55  }
  0x86   :  { %v118_v56 = vpop.permute.xlu1 %117   ;;  %v108_v57 = vpop.permute.xlu0 %107  }
  0x87   :  { %191 = vst.msk [vmem:[%s389_s1 + $0x8] sm:$0xff] %vm109_vm6, %v118_v56   ;;  %110 = vst.msk [vmem:[%s389_s1] sm:$0xff] %vm109_vm6, %v108_v57  }
  0x8a   :  { %v139_v58 = vpop.permute.xlu1 %138   ;;  %v129_v59 = vpop.permute.xlu0 %128  }
  0x8b   :  { %196 = vst.msk [vmem:[%s389_s1 + $0x8] sm:$0xff] %vm130_vm7, %v139_v58   ;;  %131 = vst.msk [vmem:[%s389_s1] sm:$0xff] %vm130_vm7, %v129_v59  }
  0x8e   :  { %v160_v60 = vpop.permute.xlu1 %159   ;;  %v150_v61 = vpop.permute.xlu0 %149  }
  0x8f   :  { %201 = vst.msk [vmem:[%s389_s1 + $0x8] sm:$0xff] %vm151_vm8, %v160_v60   ;;  %152 = vst.msk [vmem:[%s389_s1] sm:$0xff] %vm151_vm8, %v150_v61  }

// kernel: tile.49
= control target key start
LH: loop header
LB: loop body
LE: loop exit
PB: predicated region body
PF: predicated region fallthrough
CT: control target
= control target key end

     0   :  { %vm163_vm0 = vcmask 1047556   ;;  %s305_s10 = smov 32   ;;  %vm165_vm1 = vcmask 261120   ;;  %vm202_vm2 = vcmask 523520   ;;  %s452_s0 = inlined_call_operand.vmem [shape: f32[32,2,32], index: 0, kind: input, shape index: {}]   ;;  %s453_s1 = inlined_call_operand.vmem [shape: f32[32,64], index: 1, kind: output, shape index: {}]  }
   0x1   :  { %v291_v0 = vld [vmem:[%s452_s0 + $0xe] sm:$0x3]  ;;  %v292_v1 = vld [vmem:[%s452_s0 + $0xc] sm:$0x3]  ;;  %v293_v2 = vld [vmem:[%s452_s0 + $0xa] sm:$0x3] }
   0x2   :  { %129 = vst [vmem:[#allocation0 + $0x38] sm:$0x3] %v291_v0  ;;  %134 = vst [vmem:[#allocation0 + $0x30] sm:$0x3] %v292_v1  ;;  %v294_v3 = vld [vmem:[%s452_s0 + $0x8] sm:$0x3] }
   0x3   :  { %139 = vst [vmem:[#allocation0 + $0x28] sm:$0x3] %v293_v2  ;;  %v295_v4 = vld [vmem:[%s452_s0 + $0x6] sm:$0x3]  ;;  %v296_v5 = vld [vmem:[%s452_s0 + $0x4] sm:$0x3] }
   0x4   :  { %144 = vst [vmem:[#allocation0 + $0x20] sm:$0x3] %v294_v3  ;;  %149 = vst [vmem:[#allocation0 + $0x18] sm:$0x3] %v295_v4  ;;  %v297_v6 = vld [vmem:[%s452_s0 + $0x2] sm:$0x3] }
   0x5   :  { %154 = vst [vmem:[#allocation0 + $0x10] sm:$0x3] %v296_v5  ;;  %v159_v7 = vld [vmem:[%s452_s0] sm:$0x3]  ;;  %158 = vst [vmem:[#allocation0 + $0x8] sm:$0x3] %v297_v6 }
   0x6   :  { %160 = vst [vmem:[#allocation0] sm:$0x3] %v159_v7  ;;  %v275_v8 = vld [vmem:[%s452_s0 + $0x2e] sm:$0x3]  ;;  %v276_v9 = vld [vmem:[%s452_s0 + $0x2c] sm:$0x3] }
   0x7   :  { %v277_v10 = vld [vmem:[%s452_s0 + $0x2a] sm:$0x3]  ;;  %49 = vst [vmem:[#allocation0 + $0xb8] sm:$0x3] %v275_v8  ;;  %54 = vst [vmem:[#allocation0 + $0xb0] sm:$0x3] %v276_v9 }
   0x8   :  { %59 = vst [vmem:[#allocation0 + $0xa8] sm:$0x3] %v277_v10  ;;  %v278_v11 = vld [vmem:[%s452_s0 + $0x28] sm:$0x3]  ;;  %v279_v12 = vld [vmem:[%s452_s0 + $0x26] sm:$0x3] }
   0x9   :  { %v280_v13 = vld [vmem:[%s452_s0 + $0x24] sm:$0x3]  ;;  %64 = vst [vmem:[#allocation0 + $0xa0] sm:$0x3] %v278_v11  ;;  %69 = vst [vmem:[#allocation0 + $0x98] sm:$0x3] %v279_v12 }
   0xa   :  { %74 = vst [vmem:[#allocation0 + $0x90] sm:$0x3] %v280_v13  ;;  %v281_v14 = vld [vmem:[%s452_s0 + $0x22] sm:$0x3]  ;;  %v282_v15 = vld [vmem:[%s452_s0 + $0x20] sm:$0x3] }
   0xb   :  { %v283_v16 = vld [vmem:[%s452_s0 + $0x1e] sm:$0x3]  ;;  %79 = vst [vmem:[#allocation0 + $0x88] sm:$0x3] %v281_v14  ;;  %84 = vst [vmem:[#allocation0 + $0x80] sm:$0x3] %v282_v15 }
   0xc   :  { %89 = vst [vmem:[#allocation0 + $0x78] sm:$0x3] %v283_v16  ;;  %v284_v17 = vld [vmem:[%s452_s0 + $0x1c] sm:$0x3]  ;;  %v285_v18 = vld [vmem:[%s452_s0 + $0x1a] sm:$0x3] }
   0xd   :  { %v286_v19 = vld [vmem:[%s452_s0 + $0x18] sm:$0x3]  ;;  %94 = vst [vmem:[#allocation0 + $0x70] sm:$0x3] %v284_v17  ;;  %99 = vst [vmem:[#allocation0 + $0x68] sm:$0x3] %v285_v18 }
   0xe   :  { %104 = vst [vmem:[#allocation0 + $0x60] sm:$0x3] %v286_v19  ;;  %v287_v20 = vld [vmem:[%s452_s0 + $0x16] sm:$0x3]  ;;  %v288_v21 = vld [vmem:[%s452_s0 + $0x14] sm:$0x3] }
   0xf   :  { %v289_v22 = vld [vmem:[%s452_s0 + $0x12] sm:$0x3]  ;;  %109 = vst [vmem:[#allocation0 + $0x58] sm:$0x3] %v287_v20  ;;  %114 = vst [vmem:[#allocation0 + $0x50] sm:$0x3] %v288_v21 }
  0x10   :  { %119 = vst [vmem:[#allocation0 + $0x48] sm:$0x3] %v289_v22  ;;  %v290_v23 = vld [vmem:[%s452_s0 + $0x10] sm:$0x3]  ;;  %v267_v24 = vld [vmem:[%s452_s0 + $0x3e] sm:$0x3] }
  0x11   :  { %v268_v25 = vld [vmem:[%s452_s0 + $0x3c] sm:$0x3]  ;;  %v197_v26 = vld [vmem:[#allocation0 + $0x1] ss:$8 sm:$0xf0]  }
  0x12   :  { %124 = vst [vmem:[#allocation0 + $0x40] sm:$0x3] %v290_v23  ;;  %9 = vst [vmem:[#allocation0 + $0xf8] sm:$0x3] %v267_v24  ;;  %v269_v27 = vld [vmem:[%s452_s0 + $0x3a] sm:$0x3] }
  0x13   :  { %14 = vst [vmem:[#allocation0 + $0xf0] sm:$0x3] %v268_v25  ;;  %v195_v28 = vld [vmem:[#allocation0 + $0x1] ss:$8 sm:$0xf]  }
  0x14   :  { %19 = vst [vmem:[#allocation0 + $0xe8] sm:$0x3] %v269_v27  ;;  %v270_v29 = vld [vmem:[%s452_s0 + $0x38] sm:$0x3]  ;;  %v199_v30 = vsel %vm163_vm0, %v197_v26, %v195_v28  ;;  %v271_v31 = vld [vmem:[%s452_s0 + $0x36] sm:$0x3] }
  0x15   :  { %24 = vst [vmem:[#allocation0 + $0xe0] sm:$0x3] %v270_v29  ;;  %v272_v32 = vld [vmem:[%s452_s0 + $0x34] sm:$0x3]  ;;  %v273_v33 = vld [vmem:[%s452_s0 + $0x32] sm:$0x3]  ;;  %200 = vrot.lane.b32.xlu0 %v199_v30, %s305_s10 }
  0x16   :  { %v218_v34 = vld [vmem:[#allocation0 + $0x81] ss:$8 sm:$0xf0]   ;;  %29 = vst [vmem:[#allocation0 + $0xd8] sm:$0x3] %v271_v31 }
  0x17   :  { %34 = vst [vmem:[#allocation0 + $0xd0] sm:$0x3] %v272_v32  ;;  %39 = vst [vmem:[#allocation0 + $0xc8] sm:$0x3] %v273_v33  ;;  %v274_v35 = vld [vmem:[%s452_s0 + $0x30] sm:$0x3] }
  0x18   :  { %v216_v36 = vld [vmem:[#allocation0 + $0x81] ss:$8 sm:$0xf]   ;;  %44 = vst [vmem:[#allocation0 + $0xc0] sm:$0x3] %v274_v35 }
  0x19   :  { %v161_v37 = vld [vmem:[#allocation0] ss:$8 sm:$0xf]   ;;  %v220_v38 = vsel %vm163_vm0, %v218_v34, %v216_v36  ;;  %v207_v39 = vld [vmem:[#allocation0 + $0x41] ss:$8 sm:$0xf0]  }
  0x1a   :  { %v162_v40 = vld [vmem:[#allocation0] ss:$8 sm:$0xf0]   ;;  %221 = vrot.lane.b32.xlu1 %v220_v38, %s305_s10  ;;  %v205_v44 = vld [vmem:[#allocation0 + $0x41] ss:$8 sm:$0xf]  }
  0x1b   :  { %v164_v41 = vsel %vm163_vm0, %v162_v40, %v161_v37  ;;  %v177_v42 = vld [vmem:[#allocation0 + $0x80] ss:$8 sm:$0xf]   ;;  %v209_v47 = vsel %vm163_vm0, %v207_v39, %v205_v44 }
  0x1c   :  { %v179_v43 = vld [vmem:[#allocation0 + $0x80] ss:$8 sm:$0xf0]   ;;  %166 = vst.msk [vmem:[%s453_s1] sm:$0xff] %vm165_vm1, %v164_v41   ;;  %210 = vrot.lane.b32.xlu0 %v209_v47, %s305_s10 }
  0x1d   :  { %v181_v45 = vsel %vm163_vm0, %v179_v43, %v177_v42  ;;  %v168_v46 = vld [vmem:[#allocation0 + $0x40] ss:$8 sm:$0xf]   ;;  %v229_v49 = vld [vmem:[#allocation0 + $0xc1] ss:$8 sm:$0xf0]  }
  0x1e   :  { %299 = vst.msk [vmem:[%s453_s1 + $0x10] sm:$0xff] %vm165_vm1, %v181_v45   ;;  %v170_v48 = vld [vmem:[#allocation0 + $0x40] ss:$8 sm:$0xf0]  }
  0x1f   :  { %v172_v50 = vsel %vm163_vm0, %v170_v48, %v168_v46  ;;  %v188_v51 = vld [vmem:[#allocation0 + $0xc0] ss:$8 sm:$0xf0]   ;;  %v227_v52 = vld [vmem:[#allocation0 + $0xc1] ss:$8 sm:$0xf]  }
  0x20   :  { %298 = vst.msk [vmem:[%s453_s1 + $0x8] sm:$0xff] %vm165_vm1, %v172_v50   ;;  %v186_v53 = vld [vmem:[#allocation0 + $0xc0] ss:$8 sm:$0xf]   ;;  %v231_v54 = vsel %vm163_vm0, %v229_v49, %v227_v52 }
  0x21   :  { %v190_v55 = vsel %vm163_vm0, %v188_v51, %v186_v53  ;;  %232 = vrot.lane.b32.xlu1 %v231_v54, %s305_s10 }
  0x22   :  { %300 = vst.msk [vmem:[%s453_s1 + $0x18] sm:$0xff] %vm165_vm1, %v190_v55  }
  0x87   :  { %v201_v56 = vpop.permute.xlu0 %200  }
  0x88   :  { %203 = vst.msk [vmem:[%s453_s1] sm:$0xff] %vm202_vm2, %v201_v56  }
  0x8c   :  { %v222_v57 = vpop.permute.xlu1 %221  }
  0x8d   :  { %302 = vst.msk [vmem:[%s453_s1 + $0x10] sm:$0xff] %vm202_vm2, %v222_v57  }
  0x8e   :  { %v211_v58 = vpop.permute.xlu0 %210  }
  0x8f   :  { %301 = vst.msk [vmem:[%s453_s1 + $0x8] sm:$0xff] %vm202_vm2, %v211_v58  }
  0x93   :  { %v233_v59 = vpop.permute.xlu1 %232  }
  0x94   :  { %303 = vst.msk [vmem:[%s453_s1 + $0x18] sm:$0xff] %vm202_vm2, %v233_v59  }

// kernel: han_forward.1
= control target key start
LH: loop header
LB: loop body
LE: loop exit
PB: predicated region body
PF: predicated region fallthrough
CT: control target
= control target key end

     0   :  { %s3789_s0 = inlined_call_operand.vmem [shape: f32[16,32], index: 0, kind: input, shape index: {}]   ;;  %s3790_s1 = inlined_call_operand.vmem [shape: f32[16,128], index: 1, kind: input, shape index: {}]   ;;  %s3791_s2 = inlined_call_operand.vmem [shape: f32[16,128], index: 2, kind: input, shape index: {}]   ;;  %s3792_s3 = inlined_call_operand.vmem [shape: f32[128,16], index: 3, kind: input, shape index: {}]   ;;  %s3793_s4 = inlined_call_operand.vmem [shape: f32[128,64], index: 4, kind: input, shape index: {}]   ;;  %s3794_s5 = inlined_call_operand.vmem [shape: f32[128,8], index: 5, kind: input, shape index: {}]   ;;  %s3795_s6 = inlined_call_operand.vmem [shape: f32[8,128], index: 6, kind: input, shape index: {}]   ;;  %s3796_s7 = inlined_call_operand.vmem [shape: f32[32,64], index: 7, kind: input, shape index: {}]   ;;  %s3797_s8 = inlined_call_operand.vmem [shape: f32[64,2], index: 8, kind: input, shape index: {}]   ;;  %s3798_s9 = inlined_call_operand.vmem [shape: f32[32,32], index: 9, kind: input, shape index: {}]   ;;  %s3799_s10 = inlined_call_operand.vmem [shape: f32[1,32], index: 10, kind: input, shape index: {}]   ;;  %s3800_s11 = inlined_call_operand.vmem [shape: f32[32,256], index: 11, kind: input, shape index: {}]   ;;  %s3801_s12 = inlined_call_operand.vmem [shape: f32[64,64], index: 12, kind: input, shape index: {}]   ;;  %s3802_s13 = inlined_call_operand.vmem [shape: f32[1,64], index: 13, kind: input, shape index: {}]   ;;  %s3803_s14 = inlined_call_operand.vmem [shape: f32[1,64], index: 14, kind: input, shape index: {}]   ;;  %s3804_s15 = inlined_call_operand.vmem [shape: f32[32,32], index: 15, kind: input, shape index: {}]   ;;  %s3805_s16 = inlined_call_operand.vmem [shape: f32[1,32], index: 16, kind: input, shape index: {}]   ;;  %s3806_s17 = inlined_call_operand.vmem [shape: f32[32,256], index: 17, kind: input, shape index: {}]   ;;  %s3807_s18 = inlined_call_operand.vmem [shape: f32[64,64], index: 18, kind: input, shape index: {}]   ;;  %s3808_s19 = inlined_call_operand.vmem [shape: f32[1,64], index: 19, kind: input, shape index: {}]   ;;  %s3809_s20 = inlined_call_operand.vmem [shape: f32[1,64], index: 20, kind: input, shape index: {}]   ;;  %s3810_s21 = inlined_call_operand.hbm [shape: f32[16,32], index: 21, kind: output, shape index: {}]  }
   0x1   :  { %3850 = sst [smem:[#allocation26_spill]] %s3789_s0 }
   0x2   :  { %3851 = sst [smem:[#allocation27_spill]] %s3790_s1 }
   0x3   :  { %3852 = sst [smem:[#allocation28_spill]] %s3791_s2 }
   0x4   :  { %3853 = sst [smem:[#allocation29_spill]] %s3792_s3 }
   0x5   :  { %3854 = sst [smem:[#allocation30_spill]] %s3793_s4 }
   0x6   :  { %3855 = sst [smem:[#allocation31_spill]] %s3794_s5 }
   0x7   :  { %v141_v0 = vld [vmem:[%s3798_s9 + $0x18] sm:$0xff]  ;;  %v140_v1 = vld [vmem:[%s3798_s9 + $0x10] sm:$0xff]  ;;  %vm167_vm0 = vcmask 261120   ;;  %s3856_s29 = sld [smem:[#allocation26_spill]]  ;;  %v139_v3 = vld [vmem:[%s3798_s9 + $0x8] sm:$0xff] }
   0x8   :  { %2442 = vmatprep.subr.mxu1 %v141_v0 }
   0x9   :  { %2443 = vmatpush3.msra.mxu1 %v141_v0 }
   0xa   :  { %2444 = vmatprep.subr.mxu1 %v140_v1 }
   0xd   :  { %v69_v2 = vld [vmem:[%s3856_s29] sm:$0xff] }
   0xe   :  { %2450 = vmatprep.mubr.msk.f32.mxu1 %vm167_vm0, %v69_v2 }
   0xf   :  { %26 = vsyncpa [#allocation3], 0  ;;  %2445 = vmatpush3.msra.mxu1 %v140_v1  ;;  %v138_v4 = vld [vmem:[%s3798_s9] sm:$0xff]  ;;  %v70_v5 = vld [vmem:[%s3856_s29 + $0x8] sm:$0xff]  ;;  %v3817_v14 = vmov 0.0   ;;  %vm334_vm1 = vcmask 130048  }
  0x10   :  { %2446 = vmatprep.subr.mxu1 %v139_v3  ;;  %v150_v6 = vld [vmem:[%s3800_s11 + $0x38] sm:$0xff]  ;;  %v149_v7 = vld [vmem:[%s3800_s11 + $0x30] sm:$0xff]  ;;  %v148_v8 = vld [vmem:[%s3800_s11 + $0x28] sm:$0xff]  ;;  %v3819_v20 = vmov 1.0   ;;  %s3857_s2 = sld [smem:[#allocation28_spill]]  ;;  %vm508_vm4 = vcmask 64512  }
  0x11   :  { %2447 = vmatpush3.msra.mxu1 %v139_v3  ;;  %v147_v9 = vld [vmem:[%s3800_s11 + $0x20] sm:$0xff]  ;;  %v146_v10 = vld [vmem:[%s3800_s11 + $0x18] sm:$0xff]  ;;  %v145_v11 = vld [vmem:[%s3800_s11 + $0x10] sm:$0xff]  ;;  %2457 = vmatprep.mubr.msk.f32.mxu0 %vm334_vm1, %v3819_v20  ;;  %s3858_s3 = sld [smem:[#allocation31_spill]]  ;;  %vm963_vm5 = vcmask 523264   ;;  %vm1136_vm6 = vcmask 15360  }
  0x12   :  { %2448 = vmatprep.subr.mxu1 %v138_v4  ;;  %v144_v12 = vld [vmem:[%s3800_s11 + $0x8] sm:$0xff]  ;;  %v143_v13 = vld [vmem:[%s3800_s11] sm:$0xff]  ;;  %v3185_v2 = vld [vmem:[%s3796_s7 + $0x18] sm:$0xff]  ;;  %s3860_s11 = sld [smem:[#allocation29_spill]]  ;;  %s2853_s28 = smov 96  }
  0x13   :  { %2449 = vmatpush3.msra.mxu1 %v138_v4  ;;  %v2186_v16 = vld [vmem:[%s3799_s10] ss:$0 sm:$0xff]  ;;  %s3859_s10 = sld [smem:[#allocation27_spill]] }
  0x14   :  { %2451 = vmatmul.mubr.msk.f32.vlgmr.msra.gmra.mxu1 %vm167_vm0, %v70_v5  ;;  %279 = vmatprep.subr.mxu1 %v150_v6  ;;  %v3178_v1 = vld [vmem:[%s3795_s6] sm:$0xff]  ;;  %v3192_v5 = vld [vmem:[%s3796_s7 + $0x10] sm:$0xff]  ;;  %v3201_v6 = vld [vmem:[%s3796_s7 + $0x8] sm:$0xff]  ;;  %s3862_s26 = sld [smem:[#allocation30_spill]] }
  0x15   :  { %280 = vmatpush1.msra.mxu1 %v149_v7  ;;  %319 = vmatprep.mubr.f32.mxu1 %v3817_v14  ;;  %v3208_v7 = vld [vmem:[%s3796_s7] sm:$0xff] }
  0x16   :  { %281 = vmatprep.subr.mxu1 %v148_v8  ;;  %v3029_v24 = vld [vmem:[%s3857_s2 + $0x8] sm:$0xff]  ;;  %v3034_v25 = vld [vmem:[%s3857_s2] sm:$0xff] }
  0x17   :  { %282 = vmatpush1.msra.mxu1 %v147_v9  ;;  %v3043_v29 = vld [vmem:[%s3858_s3 + $0x78] sm:$0xff]  ;;  %v3048_v30 = vld [vmem:[%s3858_s3 + $0x70] sm:$0xff]  ;;  %v3055_v31 = vld [vmem:[%s3858_s3 + $0x68] sm:$0xff] }
  0x18   :  { %283 = vmatprep.subr.mxu1 %v146_v10  ;;  %v3062_v32 = vld [vmem:[%s3858_s3 + $0x60] sm:$0xff]  ;;  %v3069_v33 = vld [vmem:[%s3858_s3 + $0x58] sm:$0xff]  ;;  %v3094_v46 = vld [vmem:[%s3858_s3 + $0x50] sm:$0xff] }
  0x19   :  { %284 = vmatpush1.msra.mxu1 %v145_v11  ;;  %v3078_v38 = vld [vmem:[%s3859_s10] sm:$0xff]  ;;  %v3084_v42 = vld [vmem:[%s3859_s10 + $0x8] sm:$0xff]  ;;  %v3115_v49 = vld [vmem:[%s3858_s3 + $0x38] sm:$0xff] }
  0x1a   :  { %285 = vmatprep.subr.mxu1 %v144_v12  ;;  %vm73_vm2 = vcmp.gt.f32.partialorder %v3078_v38, 0.5  ;;  %vm74_vm3 = vcmp.gt.f32.partialorder %v3084_v42, 0.5  ;;  %v3101_v47 = vld [vmem:[%s3858_s3 + $0x48] sm:$0xff]  ;;  %v3108_v48 = vld [vmem:[%s3858_s3 + $0x40] sm:$0xff]  ;;  %v3122_v50 = vld [vmem:[%s3858_s3 + $0x30] sm:$0xff] }
  0x1b   :  { %286 = vmatpush1.msra.mxu1 %v143_v13  ;;  %v3128_v51 = vld [vmem:[%s3858_s3 + $0x28] sm:$0xff]  ;;  %v3134_v52 = vld [vmem:[%s3858_s3 + $0x20] sm:$0xff]  ;;  %v3141_v53 = vld [vmem:[%s3858_s3 + $0x18] sm:$0xff] }
  0x1c   :  { %2460 = vmatprep.subr.mxu1 %v3043_v29  ;;  %v3148_v54 = vld [vmem:[%s3858_s3 + $0x10] sm:$0xff]  ;;  %v3155_v55 = vld [vmem:[%s3858_s3 + $0x8] sm:$0xff]  ;;  %v3163_v56 = vld [vmem:[%s3858_s3] sm:$0xff] }
  0x1d   :  { %v3219_v8 = vld [vmem:[%s3860_s11] sm:$0xff]  ;;  %v1199_v38 = vld [vmem:[%s3807_s18 + $0x28] sm:$0xff] }
  0xd4   :  { %v2452_v15 = vpop.f32.mrf.mxu1 }
  0xd5   :  { %v3020_v19 = vadd.f32 %v2452_v15, %v2186_v16  ;;  %v3226_v15 = vld [vmem:[%s3860_s11 + $0x8] sm:$0xff] }
  0xd6   :  { %v240_v17 = vpop.f32.mrf.mxu1 }
  0xd7   :  { %v3015_v18 = vadd.f32 %v2186_v16, %v240_v17  ;;  %v3231_v16 = vld [vmem:[%s3860_s11 + $0x10] sm:$0xff]  ;;  %v3240_v17 = vld [vmem:[%s3860_s11 + $0x18] sm:$0xff] }
  0xd9   :  { %2189 = vmatmul.mubr.msk.f32.vlgmr.msra.gmra.mxu1 %vm167_vm0, %v3015_v18 }
  0xda   :  { %325 = vmatprep.mubr.f32.mxu1 %v3817_v14  ;;  %2461 = vmatpush3.msra.mxu1 %v3043_v29 }
  0xdb   :  { %2462 = vmatprep.subr.mxu1 %v3048_v30 }
  0xdc   :  { %2463 = vmatpush3.msra.mxu1 %v3048_v30 }
  0xdd   :  { %2190 = vmatmul.mubr.msk.f32.gmra.mxu1 %vm167_vm0, %v3020_v19  ;;  %2464 = vmatprep.subr.mxu1 %v3055_v31 }
  0xde   :  { %2465 = vmatpush3.msra.mxu1 %v3055_v31 }
  0xdf   :  { %2466 = vmatprep.subr.mxu1 %v3062_v32 }
  0xe0   :  { %2467 = vmatpush3.msra.mxu1 %v3062_v32 }
  0xe1   :  { %2468 = vmatprep.subr.mxu1 %v3069_v33 }
  0xe2   :  { %2469 = vmatpush3.msra.mxu1 %v3069_v33 }
  0xe3   :  { %2470 = vmatprep.subr.mxu1 %v3094_v46 }
  0xe4   :  { %2471 = vmatpush3.msra.mxu1 %v3094_v46 }
  0xe5   :  { %2472 = vmatprep.subr.mxu1 %v3101_v47 }
  0xe6   :  { %2473 = vmatpush3.msra.mxu1 %v3101_v47 }
  0xe7   :  { %2474 = vmatprep.subr.mxu1 %v3108_v48 }
  0xe8   :  { %2475 = vmatpush3.msra.mxu1 %v3108_v48 }
  0xe9   :  { %2476 = vmatprep.subr.mxu1 %v3115_v49 }
  0xea   :  { %2477 = vmatpush3.msra.mxu1 %v3115_v49 }
  0xeb   :  { %2478 = vmatprep.subr.mxu1 %v3122_v50 }
  0xec   :  { %2479 = vmatpush3.msra.mxu1 %v3122_v50 }
  0xed   :  { %2480 = vmatprep.subr.mxu1 %v3128_v51 }
  0xee   :  { %2481 = vmatpush3.msra.mxu1 %v3128_v51 }
  0xef   :  { %2482 = vmatprep.subr.mxu1 %v3134_v52 }
  0xf0   :  { %2483 = vmatpush3.msra.mxu1 %v3134_v52 }
  0xf1   :  { %2484 = vmatprep.subr.mxu1 %v3141_v53 }
  0xf2   :  { %2485 = vmatpush3.msra.mxu1 %v3141_v53 }
  0xf3   :  { %2486 = vmatprep.subr.mxu1 %v3148_v54 }
  0xf4   :  { %2487 = vmatpush3.msra.mxu1 %v3148_v54 }
  0xf5   :  { %2488 = vmatprep.subr.mxu1 %v3155_v55 }
  0xf6   :  { %2489 = vmatpush3.msra.mxu1 %v3155_v55 }
  0xf7   :  { %2490 = vmatprep.subr.mxu1 %v3163_v56 }
  0xf8   :  { %2491 = vmatpush3.msra.mxu1 %v3163_v56 }
 0x199   :  { %v321_v21 = vpop.f32.mrf.mxu1 }
 0x19b   :  { %v323_v22 = vpop.f32.mrf.mxu1 }
 0x19c   :  { %v332_v28 = vmul.f32 %v323_v22, %v3034_v25 }
 0x19d   :  { %v327_v23 = vpop.f32.mrf.mxu1 }
 0x19f   :  { %v329_v26 = vpop.f32.mrf.mxu1 }
 0x1a0   :  { %v333_v27 = vmul.f32 %v329_v26, %v3029_v24  ;;  %v3263_v26 = vld [vmem:[%s3860_s11 + $0x30] sm:$0xff] }
 0x1a2   :  { %2453 = vmatprep.subr.mxu0 %v333_v27 }
 0x1a3   :  { %2454 = vmatpush3.msra.mxu0 %v333_v27 }
 0x1a4   :  { %2455 = vmatprep.subr.mxu0 %v332_v28 }
 0x1a5   :  { %2456 = vmatpush3.msra.mxu0 %v332_v28  ;;  %v3272_v28 = vld [vmem:[%s3860_s11 + $0x38] sm:$0xff] }
 0x1a6   :  { %2458 = vmatmul.mubr.msk.f32.vlgmr.msra.gmra.mxu0 %vm334_vm1, %v3819_v20  ;;  %2495 = vmatprep.subr.mxu0 %v3178_v1  ;;  %v3376_v20 = vld [vmem:[%s3862_s26 + $0x60] sm:$0xff] }
 0x1a7   :  { %2496 = vmatpush3.msra.mxu0 %v3178_v1 }
 0x1a8   :  { %2500 = vmatprep.subr.mxu0 %v3185_v2 }
 0x266   :  { %v2459_v34 = vpop.f32.mrf.mxu0 }
 0x267   :  { %v414_v35 = vadd.f32 %v2459_v34, %v327_v23  ;;  %v3258_v23 = vld [vmem:[%s3860_s11 + $0x28] sm:$0xff]  ;;  %v3277_v34 = vld [vmem:[%s3860_s11 + $0x40] sm:$0xff] }
 0x268   :  { %v404_v36 = vpop.f32.mrf.mxu0 }
 0x269   :  { %v413_v37 = vadd.f32 %v404_v36, %v321_v21  ;;  %v416_v39 = vmul.f32 0.2, %v414_v35  ;;  %v3291_v36 = vld [vmem:[%s3860_s11 + $0x50] sm:$0xff] }
 0x26b   :  { %v415_v40 = vmul.f32 0.2, %v413_v37  ;;  %v418_v44 = vmax.f32 %v414_v35, %v416_v39  ;;  %v3286_v35 = vld [vmem:[%s3860_s11 + $0x48] sm:$0xff]  ;;  %v3305_v39 = vld [vmem:[%s3860_s11 + $0x60] sm:$0xff] }
 0x26d   :  { %v417_v41 = vmax.f32 %v413_v37, %v415_v40  ;;  %v420_v45 = vsel %vm74_vm3, %v418_v44, -1e+30  ;;  %v3300_v37 = vld [vmem:[%s3860_s11 + $0x58] sm:$0xff]  ;;  %v3314_v40 = vld [vmem:[%s3860_s11 + $0x68] sm:$0xff] }
 0x26f   :  { %v419_v43 = vsel %vm73_vm2, %v417_v41, -1e+30 }
 0x270   :  { %421 = vmax.xlane.f32.xlu0 %v419_v43 }
 0x274   :  { %423 = vmax.xlane.f32.xlu0 %v420_v45 }
 0x2f9   :  { %v422_v57 = vpop.xlane.xlu0 %421 }
 0x2fa   :  { %v425_v58 = vsub.f32 %v417_v41, %v422_v57  ;;  %v3319_v41 = vld [vmem:[%s3860_s11 + $0x70] sm:$0xff] }
 0x2fc   :  { %v427_v59 = vmul.f32 1.442695, %v425_v58  ;;  %v158_v58 = vld [vmem:[%s3801_s12 + $0x38] sm:$0xff] }
 0x2fd   :  { %v424_v60 = vpop.xlane.xlu0 %423  ;;  %2574 = vmatprep.subr.mxu1 %v158_v58 }
 0x2fe   :  { %2795 = vpow2.f32 %v427_v59  ;;  %v426_v61 = vsub.f32 %v418_v44, %v424_v60  ;;  %v3328_v44 = vld [vmem:[%s3860_s11 + $0x78] sm:$0xff]  ;;  %v157_v59 = vld [vmem:[%s3801_s12 + $0x30] sm:$0xff]  ;;  %v156_v60 = vld [vmem:[%s3801_s12 + $0x28] sm:$0xff] }
 0x2ff   :  { %3861 = vst [vmem:[#allocation5_spill] sm:$0xff] %v3328_v44 }
 0x300   :  { %v429_v62 = vmul.f32 1.442695, %v426_v61  ;;  %v155_v61 = vld [vmem:[%s3801_s12 + $0x20] sm:$0xff] }
 0x302   :  { %2797 = vpow2.f32 %v429_v62  ;;  %v154_v62 = vld [vmem:[%s3801_s12 + $0x18] sm:$0xff] }
 0x30b   :  { %v3168_v63 = vpop.eup %2795 }
 0x30c   :  { %2492 = vmatprep.mubr.msk.f32.mxu1 %vm73_vm2, %v3168_v63  ;;  %v431_v45 = vsel %vm73_vm2, %v3168_v63, 0.0 }
 0x30f   :  { %v2798_v0 = vpop.eup %2797 }
 0x310   :  { %2493 = vmatmul.mubr.msk.f32.vlgmr.msra.gmra.mxu1 %vm74_vm3, %v2798_v0  ;;  %v432_v21 = vsel %vm74_vm3, %v2798_v0, 0.0 }
 0x311   :  { %2575 = vmatpush3.msra.mxu1 %v158_v58 }
 0x312   :  { %2576 = vmatprep.subr.mxu1 %v157_v59 }
 0x313   :  { %2577 = vmatpush3.msra.mxu1 %v157_v59  ;;  %v3364_v59 = vld [vmem:[%s3862_s26 + $0x70] sm:$0xff] }
 0x314   :  { %2578 = vmatprep.subr.mxu1 %v156_v60 }
 0x315   :  { %2579 = vmatpush3.msra.mxu1 %v156_v60 }
 0x316   :  { %2580 = vmatprep.subr.mxu1 %v155_v61 }
 0x317   :  { %2581 = vmatpush3.msra.mxu1 %v155_v61  ;;  %v3370_v61 = vld [vmem:[%s3862_s26 + $0x68] sm:$0xff] }
 0x318   :  { %2582 = vmatprep.subr.mxu1 %v154_v62 }
 0x319   :  { %2583 = vmatpush3.msra.mxu1 %v154_v62 }
 0x3d0   :  { %v2494_v3 = vpop.f32.mrf.mxu1 }
 0x3d2   :  { %v499_v4 = vpop.f32.mrf.mxu1 }
 0x3d3   :  { %2497 = vmatprep.mubr.msk.f32.mxu0 %vm508_vm4, %v499_v4 }
 0x3d4   :  { %2498 = vmatmul.mubr.msk.f32.vlgmr.msra.gmra.mxu0 %vm508_vm4, %v2494_v3 }
 0x3d5   :  { %2501 = vmatpush3.msra.mxu0 %v3185_v2  ;;  %2508 = vmatprep.mubr.msk.f32.mxu0 %vm167_vm0, %v3015_v18  ;;  %v3245_v18 = vld [vmem:[%s3860_s11 + $0x20] sm:$0xff] }
 0x3d6   :  { %2502 = vmatprep.subr.mxu0 %v3192_v5 }
 0x3d7   :  { %2503 = vmatpush3.msra.mxu0 %v3192_v5 }
 0x3d8   :  { %2504 = vmatprep.subr.mxu0 %v3201_v6 }
 0x3d9   :  { %2505 = vmatpush3.msra.mxu0 %v3201_v6 }
 0x3da   :  { %2506 = vmatprep.subr.mxu0 %v3208_v7 }
 0x3db   :  { %2507 = vmatpush3.msra.mxu0 %v3208_v7 }
 0x3dc   :  { %2509 = vmatmul.mubr.msk.f32.vlgmr.msra.gmra.mxu0 %vm167_vm0, %v3020_v19 }
 0x3dd   :  { %2515 = vmatprep.mubr.msk.f32.mxu0 %vm334_vm1, %v3219_v8 }
 0x494   :  { %v2499_v9 = vpop.f32.mrf.mxu0 }
 0x495   :  { %v591_v10 = vmax.f32 %v2499_v9, 1e-16 }
 0x496   :  { %v581_v11 = vpop.f32.mrf.mxu0 }
 0x497   :  { %2799 = vrcp.f32 %v591_v10  ;;  %v590_v27 = vmax.f32 %v581_v11, 1e-16 }
 0x499   :  { %2801 = vrcp.f32 %v590_v27 }
 0x49c   :  { %v2510_v12 = vpop.f32.mrf.mxu0 }
 0x49d   :  { %2511 = vmatprep.subr.mxu0 %v2510_v12 }
 0x49e   :  { %v662_v13 = vpop.f32.mrf.mxu0  ;;  %2512 = vmatpush3.msra.mxu0 %v2510_v12 }
 0x49f   :  { %2513 = vmatprep.subr.mxu0 %v662_v13 }
 0x4a0   :  { %2514 = vmatpush3.msra.mxu0 %v662_v13 }
 0x4a1   :  { %2516 = vmatmul.mubr.msk.f32.vlgmr.msra.gmra.mxu0 %vm334_vm1, %v3226_v15 }
 0x4a2   :  { %2518 = vmatprep.mubr.msk.f32.mxu0 %vm334_vm1, %v3231_v16 }
 0x4a4   :  { %v2800_v19 = vpop.eup %2799 }
 0x4a5   :  { %2519 = vmatmul.mubr.msk.f32.gmra.mxu0 %vm334_vm1, %v3240_v17  ;;  %v3251_v22 = vmul.f32 %v2800_v19, %v432_v21 }
 0x4a6   :  { %2521 = vmatprep.mubr.msk.f32.mxu0 %vm334_vm1, %v3245_v18  ;;  %v2802_v43 = vpop.eup %2801 }
 0x4a7   :  { %v594_v57 = vmul.f32 %v2802_v43, %v431_v45 }
 0x4a9   :  { %2522 = vmatmul.mubr.msk.f32.gmra.mxu0 %vm334_vm1, %v3258_v23 }
 0x4aa   :  { %2524 = vmatprep.mubr.msk.f32.mxu0 %vm334_vm1, %v3263_v26 }
 0x4ad   :  { %2525 = vmatmul.mubr.msk.f32.gmra.mxu0 %vm334_vm1, %v3272_v28 }
 0x4ae   :  { %2527 = vmatprep.mubr.msk.f32.mxu0 %vm334_vm1, %v3277_v34 }
 0x4b1   :  { %2528 = vmatmul.mubr.msk.f32.gmra.mxu0 %vm334_vm1, %v3286_v35 }
 0x4b2   :  { %2530 = vmatprep.mubr.msk.f32.mxu0 %vm334_vm1, %v3291_v36 }
 0x4b5   :  { %2531 = vmatmul.mubr.msk.f32.gmra.mxu0 %vm334_vm1, %v3300_v37 }
 0x4b6   :  { %2533 = vmatprep.mubr.msk.f32.mxu0 %vm334_vm1, %v3305_v39 }
 0x4b9   :  { %2534 = vmatmul.mubr.msk.f32.gmra.mxu0 %vm334_vm1, %v3314_v40 }
 0x4ba   :  { %2536 = vmatprep.mubr.msk.f32.mxu0 %vm334_vm1, %v3319_v41 }
 0x4bd   :  { %2537 = vmatmul.mubr.msk.f32.gmra.mxu0 %vm334_vm1, %v3328_v44 }
 0x4be   :  { %2571 = vmatprep.mubr.f32.mxu0 %v594_v57  ;;  %v3359_v57 = vld [vmem:[%s3862_s26 + $0x78] sm:$0xff] }
 0x4bf   :  { %3863 = vst [vmem:[#allocation6_spill] sm:$0xff] %v3359_v57 }
 0x561   :  { %v3350_v63 = vpop.f32.mrf.mxu0 }
 0x563   :  { %v3352_v0 = vpop.f32.mrf.mxu0 }
 0x565   :  { %v2520_v3 = vpop.f32.mrf.mxu0 }
 0x567   :  { %v3354_v4 = vpop.f32.mrf.mxu0 }
 0x569   :  { %v2523_v9 = vpop.f32.mrf.mxu0 }
 0x56b   :  { %v805_v10 = vpop.f32.mrf.mxu0 }
 0x56d   :  { %v2526_v11 = vpop.f32.mrf.mxu0 }
 0x56f   :  { %v815_v12 = vpop.f32.mrf.mxu0 }
 0x571   :  { %v2529_v13 = vpop.f32.mrf.mxu0 }
 0x573   :  { %v825_v19 = vpop.f32.mrf.mxu0 }
 0x575   :  { %v2532_v21 = vpop.f32.mrf.mxu0 }
 0x577   :  { %v835_v27 = vpop.f32.mrf.mxu0 }
 0x579   :  { %v2535_v43 = vpop.f32.mrf.mxu0 }
 0x57a   :  { %v877_v44 = vmul.f32 %v2535_v43, %v3370_v61  ;;  %v3394_v43 = vld [vmem:[%s3862_s26 + $0x48] sm:$0xff] }
 0x57b   :  { %v845_v45 = vpop.f32.mrf.mxu0  ;;  %3865 = vst [vmem:[#allocation8_spill] sm:$0xff] %v3394_v43 }
 0x57d   :  { %v2538_v58 = vpop.f32.mrf.mxu0 }
 0x57e   :  { %v879_v60 = vmul.f32 %v2538_v58, %v3359_v57  ;;  %v3382_v58 = vld [vmem:[%s3862_s26 + $0x58] sm:$0xff]  ;;  %v876_v57 = vmul.f32 %v845_v45, %v3376_v20  ;;  %v3400_v45 = vld [vmem:[%s3862_s26 + $0x40] sm:$0xff] }
 0x57f   :  { %v855_v62 = vpop.f32.mrf.mxu0  ;;  %3866 = vst [vmem:[#allocation9_spill] sm:$0xff] %v3400_v45 }
 0x580   :  { %v878_v14 = vmul.f32 %v855_v62, %v3364_v59  ;;  %2539 = vmatprep.subr.mxu0 %v879_v60  ;;  %v3388_v62 = vld [vmem:[%s3862_s26 + $0x50] sm:$0xff] }
 0x581   :  { %2540 = vmatpush3.msra.mxu0 %v879_v60  ;;  %3864 = vst [vmem:[#allocation7_spill] sm:$0xff] %v3388_v62  ;;  %v875_v60 = vmul.f32 %v2532_v21, %v3382_v58  ;;  %v3406_v21 = vld [vmem:[%s3862_s26 + $0x38] sm:$0xff] }
 0x582   :  { %2541 = vmatprep.subr.mxu0 %v878_v14  ;;  %3867 = vst [vmem:[#allocation10_spill] sm:$0xff] %v3406_v21 }
 0x583   :  { %2542 = vmatpush3.msra.mxu0 %v878_v14  ;;  %v874_v14 = vmul.f32 %v835_v27, %v3388_v62  ;;  %v3412_v27 = vld [vmem:[%s3862_s26 + $0x30] sm:$0xff] }
 0x584   :  { %2543 = vmatprep.subr.mxu0 %v877_v44  ;;  %3868 = vst [vmem:[#allocation11_spill] sm:$0xff] %v3412_v27 }
 0x585   :  { %2544 = vmatpush3.msra.mxu0 %v877_v44  ;;  %v873_v44 = vmul.f32 %v2529_v13, %v3394_v43  ;;  %v3418_v13 = vld [vmem:[%s3862_s26 + $0x28] sm:$0xff] }
 0x586   :  { %2545 = vmatprep.subr.mxu0 %v876_v57  ;;  %3869 = vst [vmem:[#allocation12_spill] sm:$0xff] %v3418_v13 }
 0x587   :  { %2546 = vmatpush3.msra.mxu0 %v876_v57  ;;  %v872_v57 = vmul.f32 %v825_v19, %v3400_v45  ;;  %v3424_v19 = vld [vmem:[%s3862_s26 + $0x20] sm:$0xff] }
 0x588   :  { %2547 = vmatprep.subr.mxu0 %v875_v60  ;;  %3870 = vst [vmem:[#allocation13_spill] sm:$0xff] %v3424_v19 }
 0x589   :  { %2548 = vmatpush3.msra.mxu0 %v875_v60  ;;  %v871_v60 = vmul.f32 %v2526_v11, %v3406_v21  ;;  %v3430_v11 = vld [vmem:[%s3862_s26 + $0x18] sm:$0xff] }
 0x58a   :  { %2549 = vmatprep.subr.mxu0 %v874_v14  ;;  %3871 = vst [vmem:[#allocation14_spill] sm:$0xff] %v3430_v11 }
 0x58b   :  { %2550 = vmatpush3.msra.mxu0 %v874_v14  ;;  %v870_v14 = vmul.f32 %v815_v12, %v3412_v27  ;;  %v3436_v12 = vld [vmem:[%s3862_s26 + $0x10] sm:$0xff] }
 0x58c   :  { %2551 = vmatprep.subr.mxu0 %v873_v44  ;;  %3872 = vst [vmem:[#allocation15_spill] sm:$0xff] %v3436_v12 }
 0x58d   :  { %2552 = vmatpush3.msra.mxu0 %v873_v44  ;;  %v869_v44 = vmul.f32 %v2523_v9, %v3418_v13  ;;  %v3442_v9 = vld [vmem:[%s3862_s26 + $0x8] sm:$0xff] }
 0x58e   :  { %2553 = vmatprep.subr.mxu0 %v872_v57  ;;  %3873 = vst [vmem:[#allocation16_spill] sm:$0xff] %v3442_v9 }
 0x58f   :  { %2554 = vmatpush3.msra.mxu0 %v872_v57  ;;  %v868_v57 = vmul.f32 %v805_v10, %v3424_v19  ;;  %v3449_v10 = vld [vmem:[%s3862_s26] sm:$0xff] }
 0x590   :  { %2555 = vmatprep.subr.mxu0 %v871_v60  ;;  %3874 = vst [vmem:[#allocation17_spill] sm:$0xff] %v3449_v10 }
 0x591   :  { %2556 = vmatpush3.msra.mxu0 %v871_v60  ;;  %v867_v60 = vmul.f32 %v2520_v3, %v3430_v11  ;;  %v865_v3 = vmul.f32 %v3350_v63, %v3442_v9  ;;  %v152_v63 = vld [vmem:[%s3801_s12 + $0x8] sm:$0xff]  ;;  %v2218_v9 = vld [vmem:[%s3803_s14] ss:$0 sm:$0xff] }
 0x592   :  { %2557 = vmatprep.subr.mxu0 %v870_v14 }
 0x593   :  { %2558 = vmatpush3.msra.mxu0 %v870_v14  ;;  %v866_v14 = vmul.f32 %v3354_v4, %v3436_v12  ;;  %v153_v4 = vld [vmem:[%s3801_s12 + $0x10] sm:$0xff] }
 0x594   :  { %2559 = vmatprep.subr.mxu0 %v869_v44  ;;  %2584 = vmatprep.subr.mxu1 %v153_v4 }
 0x595   :  { %2560 = vmatpush3.msra.mxu0 %v869_v44  ;;  %v864_v44 = vmul.f32 %v3352_v0, %v3449_v10  ;;  %2585 = vmatpush3.msra.mxu1 %v153_v4  ;;  %v151_v0 = vld [vmem:[%s3801_s12] sm:$0xff]  ;;  %v3488_v4 = vld [vmem:[%s3797_s8 + $0x28] sm:$0xff] }
 0x596   :  { %2561 = vmatprep.subr.mxu0 %v868_v57  ;;  %2586 = vmatprep.subr.mxu1 %v152_v63  ;;  %3877 = vst [vmem:[#allocation20_spill] sm:$0xff] %v3488_v4 }
 0x597   :  { %2562 = vmatpush3.msra.mxu0 %v868_v57  ;;  %2587 = vmatpush3.msra.mxu1 %v152_v63  ;;  %v3495_v63 = vld [vmem:[%s3797_s8 + $0x20] sm:$0xff] }
 0x598   :  { %2563 = vmatprep.subr.mxu0 %v867_v60  ;;  %2588 = vmatprep.subr.mxu1 %v151_v0  ;;  %3878 = vst [vmem:[#allocation21_spill] sm:$0xff] %v3495_v63 }
 0x599   :  { %2564 = vmatpush3.msra.mxu0 %v867_v60  ;;  %2589 = vmatpush3.msra.mxu1 %v151_v0  ;;  %v3502_v0 = vld [vmem:[%s3797_s8 + $0x18] sm:$0xff] }
 0x59a   :  { %2565 = vmatprep.subr.mxu0 %v866_v14  ;;  %3879 = vst [vmem:[#allocation22_spill] sm:$0xff] %v3502_v0 }
 0x59b   :  { %2566 = vmatpush3.msra.mxu0 %v866_v14 }
 0x59c   :  { %2567 = vmatprep.subr.mxu0 %v865_v3 }
 0x59d   :  { %2568 = vmatpush3.msra.mxu0 %v865_v3  ;;  %v3476_v3 = vld [vmem:[%s3797_s8 + $0x38] sm:$0xff] }
 0x59e   :  { %2569 = vmatprep.subr.mxu0 %v864_v44  ;;  %3875 = vst [vmem:[#allocation18_spill] sm:$0xff] %v3476_v3  ;;  %2593 = vmatprep.subr.mxu1 %v3476_v3 }
 0x59f   :  { %2570 = vmatpush3.msra.mxu0 %v864_v44  ;;  %v3481_v44 = vld [vmem:[%s3797_s8 + $0x30] sm:$0xff] }
 0x5a0   :  { %2572 = vmatmul.mubr.f32.vlgmr.msra.gmra.mxu0 %v3251_v22  ;;  %3876 = vst [vmem:[#allocation19_spill] sm:$0xff] %v3481_v44 }
 0x660   :  { %v2573_v57 = vpop.f32.mrf.mxu0 }
 0x661   :  { %v3467_v14 = vmax.f32 %v2573_v57, 0.0  ;;  %v3509_v57 = vld [vmem:[%s3797_s8 + $0x10] sm:$0xff] }
 0x662   :  { %v946_v22 = vpop.f32.mrf.mxu0  ;;  %3880 = vst [vmem:[#allocation23_spill] sm:$0xff] %v3509_v57 }
 0x663   :  { %v3465_v60 = vmax.f32 %v946_v22, 0.0  ;;  %v3516_v22 = vld [vmem:[%s3797_s8 + $0x8] sm:$0xff] }
 0x664   :  { %3881 = vst [vmem:[#allocation24_spill] sm:$0xff] %v3516_v22 }
 0x665   :  { %2590 = vmatprep.mubr.msk.f32.mxu1 %vm963_vm5, %v3465_v60 }
 0x666   :  { %2591 = vmatmul.mubr.msk.f32.vlgmr.msra.gmra.mxu1 %vm963_vm5, %v3467_v14 }
 0x667   :  { %2594 = vmatpush3.msra.mxu1 %v3476_v3 }
 0x668   :  { %2595 = vmatprep.subr.mxu1 %v3481_v44 }
 0x669   :  { %2596 = vmatpush3.msra.mxu1 %v3481_v44 }
 0x66a   :  { %2597 = vmatprep.subr.mxu1 %v3488_v4 }
 0x66b   :  { %2598 = vmatpush3.msra.mxu1 %v3488_v4 }
 0x66c   :  { %2599 = vmatprep.subr.mxu1 %v3495_v63 }
 0x66d   :  { %2600 = vmatpush3.msra.mxu1 %v3495_v63  ;;  %v3523_v63 = vld [vmem:[%s3797_s8] sm:$0xff] }
 0x66e   :  { %2601 = vmatprep.subr.mxu1 %v3502_v0  ;;  %3882 = vst [vmem:[#allocation25_spill] sm:$0xff] %v3523_v63 }
 0x66f   :  { %2602 = vmatpush3.msra.mxu1 %v3502_v0  ;;  %v2215_v0 = vld [vmem:[%s3802_s13] ss:$0 sm:$0xff] }
 0x670   :  { %2603 = vmatprep.subr.mxu1 %v3509_v57 }
 0x671   :  { %2604 = vmatpush3.msra.mxu1 %v3509_v57 }
 0x672   :  { %2605 = vmatprep.subr.mxu1 %v3516_v22 }
 0x673   :  { %2606 = vmatpush3.msra.mxu1 %v3516_v22 }
 0x674   :  { %2607 = vmatprep.subr.mxu1 %v3523_v63 }
 0x675   :  { %2608 = vmatpush3.msra.mxu1 %v3523_v63  ;;  %v3883_v63 = vmov 1.0  }
 0x726   :  { %v2592_v4 = vpop.f32.mrf.mxu1 }
 0x727   :  { %v1042_v44 = vadd.f32 %v2592_v4, %v2215_v0 }
 0x728   :  { %v1036_v57 = vpop.f32.mrf.mxu1 }
 0x729   :  { %v1037_v3 = vadd.f32 %v2215_v0, %v1036_v57  ;;  %2803 = vtanh.f32 %v1042_v44 }
 0x72b   :  { %2805 = vtanh.f32 %v1037_v3 }
 0x736   :  { %v2804_v10 = vpop.eup %2803 }
 0x737   :  { %v1054_v11 = vmul.f32 %v2804_v10, %v2218_v9 }
 0x738   :  { %v2806_v22 = vpop.eup %2805 }
 0x739   :  { %v1053_v12 = vmul.f32 %v2806_v22, %v2218_v9 }
 0x73b   :  { %2609 = vmatprep.mubr.msk.f32.mxu1 %vm963_vm5, %v1053_v12 }
 0x73c   :  { %2610 = vmatmul.mubr.msk.f32.vlgmr.msra.gmra.mxu1 %vm963_vm5, %v1054_v11 }
 0x73d   :  { %2627 = vmatprep.mubr.msk.f32.mxu1 %vm334_vm1, %v3883_v63 }
 0x7fc   :  { %v2611_v4 = vpop.f32.mrf.mxu1 }
 0x7fd   :  { %v1138_v3 = vsel %vm1136_vm6, %v2611_v4, 0.0 }
 0x7fe   :  { %v1127_v0 = vpop.f32.mrf.mxu1 }
 0x7ff   :  { %v1137_v44 = vsel %vm1136_vm6, %v1127_v0, 0.0  ;;  %v2851_v0 = vmov 1  }
 0x800   :  { %v1139_v57 = vadd.f32 %v1138_v3, %v1137_v44  ;;  %2790 = vset.pattern.permute.xlu0 %v2851_v0  ;;  %v1193_v44 = vld [vmem:[%s3806_s17 + $0x38] sm:$0xff] }
 0x802   :  { %v1140_v19 = vrot.slane %v1139_v57, 4 }
 0x804   :  { %v1141_v13 = vadd.f32 %v1140_v19, %v1139_v57  ;;  %v2852_v19 = vmov 0  }
 0x805   :  { %2791 = vset.pattern.permute.xlu1 %v2852_v19 }
 0x806   :  { %v1142_v27 = vrot.slane %v1141_v13, 2 }
 0x808   :  { %v1143_v22 = vadd.f32 %v1142_v27, %v1141_v13 }
 0x80a   :  { %v1144_v9 = vrot.slane %v1143_v22, 1 }
 0x80c   :  { %v1145_v10 = vadd.f32 %v1144_v9, %v1143_v22 }
 0x80e   :  { %v1146_v12 = vmul.f32 0.0625, %v1145_v10 }
 0x810   :  { %v1147_v11 = vsel %vm1136_vm6, %v1146_v12, -inf }
 0x811   :  { %1148 = vmax.xlane.f32.xlu1 %v1147_v11 }
 0x89a   :  { %v1149_v21 = vpop.xlane.xlu1 %1148 }
 0x89b   :  { %v1150_v45 = vsub.f32 %v1146_v12, %v1149_v21  ;;  %v1181_v21 = vld [vmem:[%s3804_s15] sm:$0xff] }
 0x89d   :  { %v1151_v43 = vmul.f32 1.442695, %v1150_v45  ;;  %v1184_v45 = vld [vmem:[%s3804_s15 + $0x18] sm:$0xff] }
 0x89e   :  { %2612 = vmatprep.subr.mxu0 %v1184_v45 }
 0x89f   :  { %2807 = vpow2.f32 %v1151_v43  ;;  %2613 = vmatpush3.msra.mxu0 %v1184_v45  ;;  %v1183_v43 = vld [vmem:[%s3804_s15 + $0x10] sm:$0xff]  ;;  %v1191_v45 = vld [vmem:[%s3806_s17 + $0x28] sm:$0xff] }
 0x8a0   :  { %2614 = vmatprep.subr.mxu0 %v1183_v43 }
 0x8a1   :  { %2615 = vmatpush3.msra.mxu0 %v1183_v43  ;;  %v1189_v43 = vld [vmem:[%s3806_s17 + $0x18] sm:$0xff] }
 0x8ac   :  { %v2808_v62 = vpop.eup %2807 }
 0x8ad   :  { %v1153_v4 = vsel %vm1136_vm6, %v2808_v62, 0.0 }
 0x8ae   :  { %1154 = vadd.xlane.f32.xlu1 %v1153_v4 }
 0x937   :  { %v1155_v27 = vpop.xlane.xlu1 %1154 }
 0x938   :  { %2809 = vrcp.f32 %v1155_v27 }
 0x945   :  { %v2810_v13 = vpop.eup %2809 }
 0x946   :  { %v1157_v3 = vmul.f32 %v2810_v13, %v2808_v62  ;;  %v1182_v62 = vld [vmem:[%s3804_s15 + $0x8] sm:$0xff] }
 0x947   :  { %2616 = vmatprep.subr.mxu0 %v1182_v62 }
 0x948   :  { %1160 = vperm.xlu1 %2791, %v1157_v3   ;;  %1166 = vperm.xlu0 %2790, %v1157_v3   ;;  %v1192_v3 = vld [vmem:[%s3806_s17 + $0x30] sm:$0xff] }
 0x949   :  { %2617 = vmatpush3.msra.mxu0 %v1182_v62  ;;  %v1188_v62 = vld [vmem:[%s3806_s17 + $0x10] sm:$0xff] }
 0x94a   :  { %2618 = vmatprep.subr.mxu0 %v1181_v21 }
 0x94b   :  { %2619 = vmatpush3.msra.mxu0 %v1181_v21  ;;  %v1187_v21 = vld [vmem:[%s3806_s17 + $0x8] sm:$0xff] }
 0x94c   :  { %2792 = vset.pattern.permute.xlu1 %v2851_v0  ;;  %2793 = vset.pattern.permute.xlu0 %v2852_v19 }
 0x94d   :  { %1321 = vmatprep.subr.mxu0 %v1193_v44  ;;  %v1186_v44 = vld [vmem:[%s3806_s17] sm:$0xff] }
 0x9c3   :  { %v1167_v57 = vpop.permute.xlu0 %1166  ;;  %v1161_v10 = vpop.permute.xlu1 %1160 }
 0x9c4   :  { %v1169_v22 = vmul.f32 %v1167_v57, %v3465_v60  ;;  %v1170_v9 = vmul.f32 %v1167_v57, %v3467_v14  ;;  %v1163_v12 = vmul.f32 %v1161_v10, %v3465_v60  ;;  %v1164_v19 = vmul.f32 %v1161_v10, %v3467_v14  ;;  %v1190_v14 = vld [vmem:[%s3806_s17 + $0x20] sm:$0xff] }
 0x9c5   :  { %v3884_v60 = vmov 0.0  }
 0x9c6   :  { %1173 = vrot.lane.b32.xlu1 %v1169_v22, %s2853_s28  ;;  %v2221_v22 = vld [vmem:[%s3805_s16] ss:$0 sm:$0xff] }
 0x9ca   :  { %1175 = vrot.lane.b32.xlu1 %v1170_v9, %s2853_s28 }
 0xa38   :  { %v1174_v11 = vpop.permute.xlu1 %1173 }
 0xa39   :  { %v1179_v4 = vadd.f32 %v1174_v11, %v1163_v12 }
 0xa3b   :  { %2620 = vmatprep.mubr.msk.f32.mxu0 %vm167_vm0, %v1179_v4 }
 0xa3c   :  { %v1176_v27 = vpop.permute.xlu1 %1175 }
 0xa3d   :  { %v1180_v13 = vadd.f32 %v1176_v27, %v1164_v19 }
 0xa3f   :  { %2621 = vmatmul.mubr.msk.f32.vlgmr.msra.gmra.mxu0 %vm167_vm0, %v1180_v13 }
 0xa40   :  { %1322 = vmatpush1.msra.mxu0 %v1192_v3  ;;  %1361 = vmatprep.mubr.f32.mxu0 %v3884_v60 }
 0xa41   :  { %1323 = vmatprep.subr.mxu0 %v1191_v45 }
 0xa42   :  { %1324 = vmatpush1.msra.mxu0 %v1190_v14 }
 0xa43   :  { %1325 = vmatprep.subr.mxu0 %v1189_v43 }
 0xa44   :  { %1326 = vmatpush1.msra.mxu0 %v1188_v62 }
 0xa45   :  { %1327 = vmatprep.subr.mxu0 %v1187_v21 }
 0xa46   :  { %1328 = vmatpush1.msra.mxu0 %v1186_v44 }
 0xa47   :  { %2630 = vmatprep.subr.mxu0 %v3043_v29 }
 0xaff   :  { %v2622_v57 = vpop.f32.mrf.mxu0 }
 0xb00   :  { %v3600_v12 = vadd.f32 %v2622_v57, %v2221_v22 }
 0xb01   :  { %v1282_v9 = vpop.f32.mrf.mxu0 }
 0xb02   :  { %v3594_v10 = vadd.f32 %v2221_v22, %v1282_v9 }
 0xb04   :  { %2224 = vmatmul.mubr.msk.f32.vlgmr.msra.gmra.mxu0 %vm167_vm0, %v3594_v10 }
 0xb05   :  { %1367 = vmatprep.mubr.f32.mxu0 %v3884_v60  ;;  %2631 = vmatpush3.msra.mxu0 %v3043_v29 }
 0xb06   :  { %2632 = vmatprep.subr.mxu0 %v3048_v30 }
 0xb07   :  { %2633 = vmatpush3.msra.mxu0 %v3048_v30 }
 0xb08   :  { %2225 = vmatmul.mubr.msk.f32.gmra.mxu0 %vm167_vm0, %v3600_v12  ;;  %2634 = vmatprep.subr.mxu0 %v3055_v31 }
 0xb09   :  { %2635 = vmatpush3.msra.mxu0 %v3055_v31 }
 0xb0a   :  { %2636 = vmatprep.subr.mxu0 %v3062_v32 }
 0xb0b   :  { %2637 = vmatpush3.msra.mxu0 %v3062_v32 }
 0xb0c   :  { %2638 = vmatprep.subr.mxu0 %v3069_v33 }
 0xb0d   :  { %2639 = vmatpush3.msra.mxu0 %v3069_v33 }
 0xb0e   :  { %2640 = vmatprep.subr.mxu0 %v3094_v46 }
 0xb0f   :  { %2641 = vmatpush3.msra.mxu0 %v3094_v46 }
 0xb10   :  { %2642 = vmatprep.subr.mxu0 %v3101_v47 }
 0xb11   :  { %2643 = vmatpush3.msra.mxu0 %v3101_v47 }
 0xb12   :  { %2644 = vmatprep.subr.mxu0 %v3108_v48 }
 0xb13   :  { %2645 = vmatpush3.msra.mxu0 %v3108_v48 }
 0xb14   :  { %2646 = vmatprep.subr.mxu0 %v3115_v49 }
 0xb15   :  { %2647 = vmatpush3.msra.mxu0 %v3115_v49 }
 0xb16   :  { %2648 = vmatprep.subr.mxu0 %v3122_v50 }
 0xb17   :  { %2649 = vmatpush3.msra.mxu0 %v3122_v50 }
 0xb18   :  { %2650 = vmatprep.subr.mxu0 %v3128_v51 }
 0xb19   :  { %2651 = vmatpush3.msra.mxu0 %v3128_v51 }
 0xb1a   :  { %2652 = vmatprep.subr.mxu0 %v3134_v52 }
 0xb1b   :  { %2653 = vmatpush3.msra.mxu0 %v3134_v52 }
 0xb1c   :  { %2654 = vmatprep.subr.mxu0 %v3141_v53 }
 0xb1d   :  { %2655 = vmatpush3.msra.mxu0 %v3141_v53 }
 0xb1e   :  { %2656 = vmatprep.subr.mxu0 %v3148_v54 }
 0xb1f   :  { %2657 = vmatpush3.msra.mxu0 %v3148_v54 }
 0xb20   :  { %2658 = vmatprep.subr.mxu0 %v3155_v55 }
 0xb21   :  { %2659 = vmatpush3.msra.mxu0 %v3155_v55 }
 0xb22   :  { %2660 = vmatprep.subr.mxu0 %v3163_v56 }
 0xb23   :  { %2661 = vmatpush3.msra.mxu0 %v3163_v56 }
 0xbc4   :  { %v1363_v29 = vpop.f32.mrf.mxu0 }
 0xbc6   :  { %v1365_v30 = vpop.f32.mrf.mxu0 }
 0xbc7   :  { %v1374_v46 = vmul.f32 %v1365_v30, %v3034_v25 }
 0xbc8   :  { %v1369_v31 = vpop.f32.mrf.mxu0 }
 0xbca   :  { %v1371_v32 = vpop.f32.mrf.mxu0 }
 0xbcb   :  { %v1375_v33 = vmul.f32 %v1371_v32, %v3029_v24 }
 0xbcd   :  { %2623 = vmatprep.subr.mxu1 %v1375_v33 }
 0xbce   :  { %2624 = vmatpush3.msra.mxu1 %v1375_v33 }
 0xbcf   :  { %2625 = vmatprep.subr.mxu1 %v1374_v46 }
 0xbd0   :  { %2626 = vmatpush3.msra.mxu1 %v1374_v46 }
 0xbd1   :  { %2628 = vmatmul.mubr.msk.f32.vlgmr.msra.gmra.mxu1 %vm334_vm1, %v3883_v63  ;;  %2665 = vmatprep.subr.mxu1 %v3178_v1 }
 0xbd2   :  { %2666 = vmatpush3.msra.mxu1 %v3178_v1 }
 0xbd3   :  { %2670 = vmatprep.subr.mxu1 %v3185_v2 }
 0xc91   :  { %v2629_v47 = vpop.f32.mrf.mxu1 }
 0xc92   :  { %v1452_v48 = vadd.f32 %v2629_v47, %v1369_v31 }
 0xc93   :  { %v1442_v49 = vpop.f32.mrf.mxu1 }
 0xc94   :  { %v1454_v50 = vmul.f32 0.2, %v1452_v48  ;;  %v1451_v24 = vadd.f32 %v1442_v49, %v1363_v29  ;;  %v3886_v29 = vld [vmem:[#allocation6_spill] sm:$0xff] }
 0xc96   :  { %v1453_v51 = vmul.f32 0.2, %v1451_v24  ;;  %v1456_v25 = vmax.f32 %v1452_v48, %v1454_v50  ;;  %v3887_v48 = vld [vmem:[#allocation7_spill] sm:$0xff]  ;;  %v3888_v50 = vld [vmem:[#allocation8_spill] sm:$0xff] }
 0xc98   :  { %v1458_v52 = vsel %vm74_vm3, %v1456_v25, -1e+30  ;;  %v1455_v53 = vmax.f32 %v1451_v24, %v1453_v51  ;;  %v3889_v24 = vld [vmem:[#allocation9_spill] sm:$0xff]  ;;  %v3890_v51 = vld [vmem:[#allocation10_spill] sm:$0xff] }
 0xc99   :  { %1461 = vmax.xlane.f32.xlu0 %v1458_v52  ;;  %v3892_v52 = vld [vmem:[#allocation12_spill] sm:$0xff] }
 0xc9a   :  { %v1457_v54 = vsel %vm73_vm2, %v1455_v53, -1e+30 }
 0xc9b   :  { %1459 = vmax.xlane.f32.xlu1 %v1457_v54  ;;  %v3893_v54 = vld [vmem:[#allocation13_spill] sm:$0xff] }
 0xd22   :  { %v1462_v55 = vpop.xlane.xlu0 %1461 }
 0xd23   :  { %v1464_v56 = vsub.f32 %v1456_v25, %v1462_v55  ;;  %v3891_v25 = vld [vmem:[#allocation11_spill] sm:$0xff] }
 0xd24   :  { %v1460_v1 = vpop.xlane.xlu1 %1459 }
 0xd25   :  { %v1463_v63 = vsub.f32 %v1455_v53, %v1460_v1  ;;  %v1467_v11 = vmul.f32 1.442695, %v1464_v56  ;;  %v3894_v56 = vld [vmem:[#allocation14_spill] sm:$0xff] }
 0xd27   :  { %v1465_v4 = vmul.f32 1.442695, %v1463_v63  ;;  %v3895_v63 = vld [vmem:[#allocation15_spill] sm:$0xff] }
 0xd29   :  { %2811 = vpow2.f32 %v1465_v4  ;;  %v3896_v4 = vld [vmem:[#allocation16_spill] sm:$0xff] }
 0xd2a   :  { %2813 = vpow2.f32 %v1467_v11 }
 0xd36   :  { %v2812_v19 = vpop.eup %2811 }
 0xd37   :  { %v2814_v27 = vpop.eup %2813  ;;  %2662 = vmatprep.mubr.msk.f32.mxu0 %vm73_vm2, %v2812_v19 }
 0xd38   :  { %2663 = vmatmul.mubr.msk.f32.vlgmr.msra.gmra.mxu0 %vm74_vm3, %v2814_v27 }
 0xdf8   :  { %v2664_v13 = vpop.f32.mrf.mxu0 }
 0xdfa   :  { %v1537_v3 = vpop.f32.mrf.mxu0 }
 0xdfb   :  { %2667 = vmatprep.mubr.msk.f32.mxu1 %vm508_vm4, %v1537_v3  ;;  %v1196_v3 = vld [vmem:[%s3807_s18 + $0x10] sm:$0xff] }
 0xdfc   :  { %2668 = vmatmul.mubr.msk.f32.vlgmr.msra.gmra.mxu1 %vm508_vm4, %v2664_v13 }
 0xdfd   :  { %2671 = vmatpush3.msra.mxu1 %v3185_v2  ;;  %2678 = vmatprep.mubr.msk.f32.mxu1 %vm167_vm0, %v3594_v10 }
 0xdfe   :  { %2672 = vmatprep.subr.mxu1 %v3192_v5 }
 0xdff   :  { %2673 = vmatpush3.msra.mxu1 %v3192_v5 }
 0xe00   :  { %2674 = vmatprep.subr.mxu1 %v3201_v6 }
 0xe01   :  { %2675 = vmatpush3.msra.mxu1 %v3201_v6 }
 0xe02   :  { %2676 = vmatprep.subr.mxu1 %v3208_v7 }
 0xe03   :  { %2677 = vmatpush3.msra.mxu1 %v3208_v7  ;;  %v1470_v7 = vsel %vm74_vm3, %v2814_v27, 0.0  ;;  %v3897_v27 = vld [vmem:[#allocation17_spill] sm:$0xff] }
 0xe04   :  { %2679 = vmatmul.mubr.msk.f32.vlgmr.msra.gmra.mxu1 %vm167_vm0, %v3600_v12 }
 0xe05   :  { %2685 = vmatprep.mubr.msk.f32.mxu1 %vm334_vm1, %v3219_v8 }
 0xebc   :  { %v2669_v2 = vpop.f32.mrf.mxu1 }
 0xebd   :  { %v1628_v45 = vmax.f32 %v2669_v2, 1e-16  ;;  %v1195_v2 = vld [vmem:[%s3807_s18 + $0x8] sm:$0xff] }
 0xebe   :  { %v1618_v60 = vpop.f32.mrf.mxu1 }
 0xebf   :  { %2815 = vrcp.f32 %v1628_v45  ;;  %v1627_v43 = vmax.f32 %v1618_v60, 1e-16  ;;  %v1194_v45 = vld [vmem:[%s3807_s18] sm:$0xff]  ;;  %v3898_v60 = vld [vmem:[#allocation18_spill] sm:$0xff] }
 0xec1   :  { %2817 = vrcp.f32 %v1627_v43  ;;  %v3900_v43 = vld [vmem:[#allocation20_spill] sm:$0xff] }
 0xec4   :  { %v2680_v14 = vpop.f32.mrf.mxu1 }
 0xec5   :  { %2681 = vmatprep.subr.mxu1 %v2680_v14 }
 0xec6   :  { %v1699_v5 = vpop.f32.mrf.mxu1  ;;  %2682 = vmatpush3.msra.mxu1 %v2680_v14 }
 0xec7   :  { %2683 = vmatprep.subr.mxu1 %v1699_v5 }
 0xec8   :  { %2684 = vmatpush3.msra.mxu1 %v1699_v5 }
 0xec9   :  { %2686 = vmatmul.mubr.msk.f32.vlgmr.msra.gmra.mxu1 %vm334_vm1, %v3226_v15  ;;  %v1469_v15 = vsel %vm73_vm2, %v2812_v19, 0.0 }
 0xeca   :  { %2688 = vmatprep.mubr.msk.f32.mxu1 %vm334_vm1, %v3231_v16 }
 0xecc   :  { %v2816_v6 = vpop.eup %2815 }
 0xecd   :  { %2689 = vmatmul.mubr.msk.f32.gmra.mxu1 %vm334_vm1, %v3240_v17  ;;  %v3672_v8 = vmul.f32 %v2816_v6, %v1470_v7  ;;  %v3885_v17 = vld [vmem:[#allocation5_spill] sm:$0xff] }
 0xece   :  { %2691 = vmatprep.mubr.msk.f32.mxu1 %vm334_vm1, %v3245_v18  ;;  %v2818_v42 = vpop.eup %2817  ;;  %v1201_v18 = vld [vmem:[%s3807_s18 + $0x38] sm:$0xff] }
 0xecf   :  { %v1631_v16 = vmul.f32 %v2818_v42, %v1469_v15  ;;  %2744 = vmatprep.subr.mxu0 %v1201_v18  ;;  %v3901_v42 = vld [vmem:[#allocation21_spill] sm:$0xff]  ;;  %v3902_v15 = vld [vmem:[#allocation22_spill] sm:$0xff] }
 0xed0   :  { %2745 = vmatpush3.msra.mxu0 %v1201_v18  ;;  %v3905_v18 = vld [vmem:[#allocation25_spill] sm:$0xff] }
 0xed1   :  { %2692 = vmatmul.mubr.msk.f32.gmra.mxu1 %vm334_vm1, %v3258_v23  ;;  %v1200_v23 = vld [vmem:[%s3807_s18 + $0x30] sm:$0xff] }
 0xed2   :  { %2694 = vmatprep.mubr.msk.f32.mxu1 %vm334_vm1, %v3263_v26  ;;  %2746 = vmatprep.subr.mxu0 %v1200_v23  ;;  %v1198_v26 = vld [vmem:[%s3807_s18 + $0x20] sm:$0xff] }
 0xed3   :  { %2747 = vmatpush3.msra.mxu0 %v1200_v23  ;;  %v2250_v23 = vld [vmem:[%s3808_s19] ss:$0 sm:$0xff]  ;;  %s2854_s19 = smov [#allocation2]  }
 0xed4   :  { %2748 = vmatprep.subr.mxu0 %v1199_v38 }
 0xed5   :  { %2695 = vmatmul.mubr.msk.f32.gmra.mxu1 %vm334_vm1, %v3272_v28  ;;  %2749 = vmatpush3.msra.mxu0 %v1199_v38  ;;  %v1197_v28 = vld [vmem:[%s3807_s18 + $0x18] sm:$0xff] }
 0xed6   :  { %2697 = vmatprep.mubr.msk.f32.mxu1 %vm334_vm1, %v3277_v34  ;;  %2750 = vmatprep.subr.mxu0 %v1198_v26 }
 0xed7   :  { %2751 = vmatpush3.msra.mxu0 %v1198_v26 }
 0xed8   :  { %2752 = vmatprep.subr.mxu0 %v1197_v28 }
 0xed9   :  { %2698 = vmatmul.mubr.msk.f32.gmra.mxu1 %vm334_vm1, %v3286_v35  ;;  %2753 = vmatpush3.msra.mxu0 %v1197_v28 }
 0xeda   :  { %2700 = vmatprep.mubr.msk.f32.mxu1 %vm334_vm1, %v3291_v36  ;;  %2754 = vmatprep.subr.mxu0 %v1196_v3 }
 0xedb   :  { %2755 = vmatpush3.msra.mxu0 %v1196_v3 }
 0xedc   :  { %2756 = vmatprep.subr.mxu0 %v1195_v2 }
 0xedd   :  { %2701 = vmatmul.mubr.msk.f32.gmra.mxu1 %vm334_vm1, %v3300_v37  ;;  %2757 = vmatpush3.msra.mxu0 %v1195_v2 }
 0xede   :  { %2703 = vmatprep.mubr.msk.f32.mxu1 %vm334_vm1, %v3305_v39  ;;  %2758 = vmatprep.subr.mxu0 %v1194_v45 }
 0xedf   :  { %2759 = vmatpush3.msra.mxu0 %v1194_v45 }
 0xee0   :  { %2763 = vmatprep.subr.mxu0 %v3898_v60 }
 0xee1   :  { %2704 = vmatmul.mubr.msk.f32.gmra.mxu1 %vm334_vm1, %v3314_v40 }
 0xee2   :  { %2706 = vmatprep.mubr.msk.f32.mxu1 %vm334_vm1, %v3319_v41 }
 0xee5   :  { %2707 = vmatmul.mubr.msk.f32.gmra.mxu1 %vm334_vm1, %v3885_v17  ;;  %v3904_v17 = vld [vmem:[#allocation24_spill] sm:$0xff] }
 0xee6   :  { %2741 = vmatprep.mubr.f32.mxu1 %v1631_v16  ;;  %v3903_v16 = vld [vmem:[#allocation23_spill] sm:$0xff] }
 0xf89   :  { %v2687_v34 = vpop.f32.mrf.mxu1 }
 0xf8a   :  { %v1854_v19 = vmul.f32 %v2687_v34, %v3896_v4 }
 0xf8b   :  { %v1774_v35 = vpop.f32.mrf.mxu1 }
 0xf8c   :  { %v1853_v13 = vmul.f32 %v1774_v35, %v3897_v27 }
 0xf8d   :  { %v2690_v36 = vpop.f32.mrf.mxu1 }
 0xf8e   :  { %v1856_v1 = vmul.f32 %v2690_v36, %v3894_v56  ;;  %v2253_v36 = vld [vmem:[%s3809_s20] ss:$0 sm:$0xff]  ;;  %s2175_s20 = sshll.u32 %s2854_s19, 4  ;;  %s2176_s20 = int_to_ptr.vmem [resolvable:$true] %s2175_s20 }
 0xf8f   :  { %v1784_v37 = vpop.f32.mrf.mxu1  ;;  %s2827_s11 = scalar_lea.vmem %s2176_s20, 256  ;;  %p2832_p1 = scmp.lt.s32.totalorder %s2176_s20, %s2176_s20 }
 0xf90   :  { %v1855_v11 = vmul.f32 %v1784_v37, %v3895_v63  ;;  %p2828_p0 = scmp.ne.s32.totalorder %s2176_s20, %s2827_s11  ;;  %p2833_p2 = scmp.lt.s32.totalorder %s2827_s11, %s2827_s11 }
 0xf91   :  { %v2693_v39 = vpop.f32.mrf.mxu1 }
 0xf92   :  { %v1858_v53 = vmul.f32 %v2693_v39, %v3892_v52  ;;  %p2834_p3 = por %p2833_p2, %p2832_p1 }
 0xf93   :  { %v1794_v40 = vpop.f32.mrf.mxu1 }
 0xf94   :  { %v1857_v55 = vmul.f32 %v1794_v40, %v3893_v54  ;;  %p2835_p4 = pnand %p2834_p3, %p2828_p0 }
 0xf95   :  { %v2696_v41 = vpop.f32.mrf.mxu1 }
 0xf97   :  { %v1804_v62 = vpop.f32.mrf.mxu1 }
 0xf99   :  { %v2699_v21 = vpop.f32.mrf.mxu1 }
 0xf9b   :  { %v1814_v44 = vpop.f32.mrf.mxu1 }
 0xf9d   :  { %v2702_v57 = vpop.f32.mrf.mxu1 }
 0xf9e   :  { %v1864_v47 = vmul.f32 %v2702_v57, %v3382_v58  ;;  %v1859_v58 = vmul.f32 %v1804_v62, %v3891_v25 }
 0xf9f   :  { %v1824_v22 = vpop.f32.mrf.mxu1 }
 0xfa0   :  { %v1863_v49 = vmul.f32 %v1824_v22, %v3887_v48 }
 0xfa1   :  { %v2705_v9 = vpop.f32.mrf.mxu1 }
 0xfa2   :  { %v1866_v33 = vmul.f32 %v2705_v9, %v3370_v61  ;;  %v1861_v61 = vmul.f32 %v1814_v44, %v3889_v24 }
 0xfa3   :  { %v1834_v10 = vpop.f32.mrf.mxu1 }
 0xfa4   :  { %v1865_v46 = vmul.f32 %v1834_v10, %v3376_v20  ;;  %v1860_v20 = vmul.f32 %v2696_v41, %v3890_v51 }
 0xfa5   :  { %v2708_v12 = vpop.f32.mrf.mxu1 }
 0xfa6   :  { %v1868_v30 = vmul.f32 %v2708_v12, %v3886_v29 }
 0xfa7   :  { %v1844_v31 = vpop.f32.mrf.mxu1 }
 0xfa8   :  { %v1867_v32 = vmul.f32 %v1844_v31, %v3364_v59  ;;  %2709 = vmatprep.subr.mxu1 %v1868_v30  ;;  %v1862_v59 = vmul.f32 %v2699_v21, %v3888_v50 }
 0xfa9   :  { %2710 = vmatpush3.msra.mxu1 %v1868_v30 }
 0xfaa   :  { %2711 = vmatprep.subr.mxu1 %v1867_v32 }
 0xfab   :  { %2712 = vmatpush3.msra.mxu1 %v1867_v32 }
 0xfac   :  { %2713 = vmatprep.subr.mxu1 %v1866_v33 }
 0xfad   :  { %2714 = vmatpush3.msra.mxu1 %v1866_v33 }
 0xfae   :  { %2715 = vmatprep.subr.mxu1 %v1865_v46 }
 0xfaf   :  { %2716 = vmatpush3.msra.mxu1 %v1865_v46 }
 0xfb0   :  { %2717 = vmatprep.subr.mxu1 %v1864_v47 }
 0xfb1   :  { %2718 = vmatpush3.msra.mxu1 %v1864_v47 }
 0xfb2   :  { %2719 = vmatprep.subr.mxu1 %v1863_v49 }
 0xfb3   :  { %2720 = vmatpush3.msra.mxu1 %v1863_v49 }
 0xfb4   :  { %2721 = vmatprep.subr.mxu1 %v1862_v59 }
 0xfb5   :  { %2722 = vmatpush3.msra.mxu1 %v1862_v59 }
 0xfb6   :  { %2723 = vmatprep.subr.mxu1 %v1861_v61 }
 0xfb7   :  { %2724 = vmatpush3.msra.mxu1 %v1861_v61 }
 0xfb8   :  { %2725 = vmatprep.subr.mxu1 %v1860_v20 }
 0xfb9   :  { %2726 = vmatpush3.msra.mxu1 %v1860_v20 }
 0xfba   :  { %2727 = vmatprep.subr.mxu1 %v1859_v58 }
 0xfbb   :  { %2728 = vmatpush3.msra.mxu1 %v1859_v58 }
 0xfbc   :  { %2729 = vmatprep.subr.mxu1 %v1858_v53 }
 0xfbd   :  { %2730 = vmatpush3.msra.mxu1 %v1858_v53 }
 0xfbe   :  { %2731 = vmatprep.subr.mxu1 %v1857_v55 }
 0xfbf   :  { %2732 = vmatpush3.msra.mxu1 %v1857_v55 }
 0xfc0   :  { %2733 = vmatprep.subr.mxu1 %v1856_v1 }
 0xfc1   :  { %2734 = vmatpush3.msra.mxu1 %v1856_v1 }
 0xfc2   :  { %2735 = vmatprep.subr.mxu1 %v1855_v11 }
 0xfc3   :  { %2736 = vmatpush3.msra.mxu1 %v1855_v11 }
 0xfc4   :  { %2737 = vmatprep.subr.mxu1 %v1854_v19 }
 0xfc5   :  { %2738 = vmatpush3.msra.mxu1 %v1854_v19 }
 0xfc6   :  { %2739 = vmatprep.subr.mxu1 %v1853_v13 }
 0xfc7   :  { %2740 = vmatpush3.msra.mxu1 %v1853_v13 }
 0xfc8   :  { %2742 = vmatmul.mubr.f32.vlgmr.msra.gmra.mxu1 %v3672_v8  ;;  %v3899_v8 = vld [vmem:[#allocation19_spill] sm:$0xff] }
0x1088   :  { %v2743_v14 = vpop.f32.mrf.mxu1 }
0x1089   :  { %v3744_v7 = vmax.f32 %v2743_v14, 0.0 }
0x108a   :  { %v1935_v5 = vpop.f32.mrf.mxu1 }
0x108b   :  { %v3742_v6 = vmax.f32 %v1935_v5, 0.0 }
0x108d   :  { %2760 = vmatprep.mubr.msk.f32.mxu0 %vm963_vm5, %v3742_v6 }
0x108e   :  { %2761 = vmatmul.mubr.msk.f32.vlgmr.msra.gmra.mxu0 %vm963_vm5, %v3744_v7 }
0x108f   :  { %2764 = vmatpush3.msra.mxu0 %v3898_v60 }
0x1090   :  { %2765 = vmatprep.subr.mxu0 %v3899_v8 }
0x1091   :  { %2766 = vmatpush3.msra.mxu0 %v3899_v8 }
0x1092   :  { %2767 = vmatprep.subr.mxu0 %v3900_v43 }
0x1093   :  { %2768 = vmatpush3.msra.mxu0 %v3900_v43 }
0x1094   :  { %2769 = vmatprep.subr.mxu0 %v3901_v42 }
0x1095   :  { %2770 = vmatpush3.msra.mxu0 %v3901_v42 }
0x1096   :  { %2771 = vmatprep.subr.mxu0 %v3902_v15 }
0x1097   :  { %2772 = vmatpush3.msra.mxu0 %v3902_v15 }
0x1098   :  { %2773 = vmatprep.subr.mxu0 %v3903_v16 }
0x1099   :  { %2774 = vmatpush3.msra.mxu0 %v3903_v16 }
0x109a   :  { %2775 = vmatprep.subr.mxu0 %v3904_v17 }
0x109b   :  { %2776 = vmatpush3.msra.mxu0 %v3904_v17 }
0x109c   :  { %2777 = vmatprep.subr.mxu0 %v3905_v18 }
0x109d   :  { %2778 = vmatpush3.msra.mxu0 %v3905_v18 }
0x114e   :  { %v2762_v38 = vpop.f32.mrf.mxu0 }
0x114f   :  { %v2030_v26 = vadd.f32 %v2762_v38, %v2250_v23 }
0x1150   :  { %v2024_v28 = vpop.f32.mrf.mxu0 }
0x1151   :  { %v2025_v34 = vadd.f32 %v2250_v23, %v2024_v28  ;;  %2819 = vtanh.f32 %v2030_v26 }
0x1153   :  { %2821 = vtanh.f32 %v2025_v34 }
0x115e   :  { %v2820_v35 = vpop.eup %2819 }
0x115f   :  { %v2042_v40 = vmul.f32 %v2820_v35, %v2253_v36 }
0x1160   :  { %v2822_v37 = vpop.eup %2821 }
0x1161   :  { %v2041_v39 = vmul.f32 %v2822_v37, %v2253_v36 }
0x1163   :  { %2779 = vmatprep.mubr.msk.f32.mxu0 %vm963_vm5, %v2041_v39 }
0x1164   :  { %2780 = vmatmul.mubr.msk.f32.vlgmr.msra.gmra.mxu0 %vm963_vm5, %v2042_v40 }
0x1224   :  { %v2781_v41 = vpop.f32.mrf.mxu0 }
0x1225   :  { %v2125_v21 = vsel %vm1136_vm6, %v2781_v41, 0.0 }
0x1226   :  { %v2115_v62 = vpop.f32.mrf.mxu0 }
0x1227   :  { %v2124_v44 = vsel %vm1136_vm6, %v2115_v62, 0.0 }
0x1228   :  { %v2126_v57 = vadd.f32 %v2125_v21, %v2124_v44 }
0x122a   :  { %v2127_v22 = vrot.slane %v2126_v57, 4 }
0x122c   :  { %v2128_v9 = vadd.f32 %v2127_v22, %v2126_v57 }
0x122e   :  { %v2129_v10 = vrot.slane %v2128_v9, 2 }
0x1230   :  { %v2130_v12 = vadd.f32 %v2129_v10, %v2128_v9 }
0x1232   :  { %v2131_v29 = vrot.slane %v2130_v12, 1 }
0x1234   :  { %v2132_v30 = vadd.f32 %v2131_v29, %v2130_v12 }
0x1236   :  { %v2133_v31 = vmul.f32 0.0625, %v2132_v30 }
0x1238   :  { %v2134_v32 = vsel %vm1136_vm6, %v2133_v31, -inf }
0x1239   :  { %2135 = vmax.xlane.f32.xlu1 %v2134_v32 }
0x12c2   :  { %v2136_v33 = vpop.xlane.xlu1 %2135 }
0x12c3   :  { %v2137_v46 = vsub.f32 %v2133_v31, %v2136_v33 }
0x12c5   :  { %v2138_v47 = vmul.f32 1.442695, %v2137_v46 }
0x12c7   :  { %2823 = vpow2.f32 %v2138_v47 }
0x12d4   :  { %v2824_v48 = vpop.eup %2823 }
0x12d5   :  { %v2140_v49 = vsel %vm1136_vm6, %v2824_v48, 0.0 }
0x12d6   :  { %2141 = vadd.xlane.f32.xlu1 %v2140_v49 }
0x135f   :  { %v2142_v50 = vpop.xlane.xlu1 %2141 }
0x1360   :  { %2825 = vrcp.f32 %v2142_v50 }
0x136d   :  { %v2826_v59 = vpop.eup %2825 }
0x136e   :  { %v2144_v24 = vmul.f32 %v2826_v59, %v2824_v48 }
0x1370   :  { %2147 = vperm.xlu0 %2793, %v2144_v24   ;;  %2153 = vperm.xlu1 %2792, %v2144_v24  }
0x1374   :  { %2794 = vset.pattern.permute.xlu0 %v2851_v0 }
0x13eb   :  { %v2154_v61 = vpop.permute.xlu1 %2153  ;;  %v2148_v25 = vpop.permute.xlu0 %2147 }
0x13ec   :  { %v2156_v51 = vmul.f32 %v2154_v61, %v3742_v6  ;;  %v2157_v20 = vmul.f32 %v2154_v61, %v3744_v7  ;;  %v2150_v58 = vmul.f32 %v2148_v25, %v3742_v6  ;;  %v2151_v54 = vmul.f32 %v2148_v25, %v3744_v7 }
0x13ee   :  { %2160 = vrot.lane.b32.xlu1 %v2156_v51, %s2853_s28 }
0x13f2   :  { %2162 = vrot.lane.b32.xlu1 %v2157_v20, %s2853_s28 }
0x1460   :  { %v2161_v52 = vpop.permute.xlu1 %2160 }
0x1461   :  { %v2166_v53 = vadd.f32 %v2161_v52, %v2150_v58 }
0x1463   :  { %2168 = vst.msk [vmem:[#allocation2] sm:$0xff] %vm167_vm0, %v2166_v53 }
0x1464   :  { %v2163_v0 = vpop.permute.xlu1 %2162 }
0x1465   :  { %v2167_v55 = vadd.f32 %v2163_v0, %v2151_v54 }
0x1467   :  { %2169 = vst.msk [vmem:[#allocation2 + $0x8] sm:$0xff] %vm167_vm0, %v2167_v55 }
0x1468   :  { %2838 = shalt.err (!%p2835_p4)
}
0x1469   :  { %s2855_s28 = smov 128   ;;  %s2856_s23 = smov 8  }
0x146a   :  { %2181 = dma.vmem_to_hbm [thread:$0]  %s2176_s20, 256, %s3810_s21, [#allocation3], %s2855_s28, %s2855_s28, %s2856_s23  }
0x146b   :  { %2847 = dma.done.wait [#allocation3], 256  }
0x146c   :  { %2848 = vsyncadd [#allocation3], 4294967040 }
0x146d   :  { %2185 = vsyncpa [#allocation3], 1 }

</bundles_post_ra>
